<compile_context>
chip_gen: v7x
topology: tpu7x:2x2x1
jax: 0.10.0
libtpu: 0.0.40
codegen_flags: <defaults>
</compile_context>

<pallas_src>
import math
from functools import partial

import jax
import jax.numpy as jnp
from jax.experimental import pallas as pl
from jax.experimental.pallas import tpu as pltpu


def mhsa_kernel(x_ref, wq_ref, bq_ref, wkv_ref, bkv_ref, wf_ref, bf_ref,
                o_ref, kh_ref, vh_ref, *,
                num_heads, depth, s_q, compute_dtype):
    """One (batch, query-tile) grid step.

    x_ref  : (1, S, H)    full-sequence input slab (block constant across qi)
    wq_ref : (H, H)       pre-transposed Q weight, 1/sqrt(depth) folded in
    bq_ref : (1, H)       Q bias (f32, scale folded in)
    wkv_ref: (H, 2H)      fused, pre-transposed K|V weight
    bkv_ref: (1, 2H)      fused K|V bias (f32)
    wf_ref : (H, H)       pre-transposed output-projection weight
    bf_ref : (1, H)       output-projection bias (f32)
    o_ref  : (1, S_q, H)  output rows [qi*S_q, (qi+1)*S_q)
    kh_ref : (nh, S, d)   VMEM scratch — head-major K, written only at qi == 0
    vh_ref : (nh, S, d)   VMEM scratch — head-major V, written only at qi == 0
    """
    qi = pl.program_id(1)
    H = num_heads * depth
    S = x_ref.shape[1]
    f32 = jnp.float32

    # --- K / V projection + head-major transpose ONCE per batch element. ---
    # qi is an "arbitrary" grid axis, so this scratch is carried across the
    # query tiles of the current batch row.
    @pl.when(qi == 0)
    def _():
        x_all = x_ref[0]                                            # (S, H)
        kv = jnp.dot(x_all, wkv_ref[...],
                     preferred_element_type=f32) + bkv_ref[...]     # (S, 2H) f32
        k = kv[:, :H].astype(compute_dtype)
        v = kv[:, H:].astype(compute_dtype)
        kh_ref[...] = pltpu.einshape("shd->hsd", k.reshape(S, num_heads, depth))
        vh_ref[...] = pltpu.einshape("shd->hsd", v.reshape(S, num_heads, depth))

    # --- Q projection for this tile's rows only (scale folded into wq/bq). ---
    row0 = pl.multiple_of(qi * s_q, s_q)
    x_q = x_ref[0, pl.ds(row0, s_q), :]                             # (S_q, H)
    q = (jnp.dot(x_q, wq_ref[...], preferred_element_type=f32)
         + bq_ref[...]).astype(compute_dtype)                       # (S_q, H)
    qh = pltpu.einshape("shd->hsd", q.reshape(s_q, num_heads, depth))  # (nh,S_q,d)

    # --- Scaled dot-product attention with f32 softmax statistics. ---
    # TODO(synk): for very long S, replace the materialized (nh, S_q, S)
    # logits/p with a streamed-KV (flash-style) inner loop + online softmax.
    logits = jnp.einsum("hqd,hkd->hqk", qh, kh_ref[...],
                        preferred_element_type=f32)                 # (nh, S_q, S)
    logits = logits - jnp.max(logits, axis=-1, keepdims=True)
    p = jnp.exp(logits)
    row_sum = jnp.sum(p, axis=-1, keepdims=True)                    # (nh, S_q, 1)

    ctx = jnp.einsum("hqk,hkd->hqd", p.astype(compute_dtype), vh_ref[...],
                     preferred_element_type=f32)                    # (nh, S_q, d)
    # Deferred softmax normalization: scale the small context tensor instead
    # of dividing the whole (nh, S_q, S) probability matrix.
    approx = bool(jnp.dtype(compute_dtype) == jnp.dtype(jnp.bfloat16))
    ctx = ctx * pl.reciprocal(row_sum, approx=approx)

    # --- Output projection as ONE full-width (S_q, H) @ (H, H) GEMM. ---
    ctx_flat = pltpu.einshape("hqd->qhd",
                              ctx.astype(compute_dtype)).reshape(s_q, H)
    out = jnp.dot(ctx_flat, wf_ref[...],
                  preferred_element_type=f32) + bf_ref[...]         # (S_q, H) f32
    o_ref[0] = out.astype(o_ref.dtype)


def _tpu_vmem_capacity_bytes():
    try:
        return int(pltpu.get_tpu_info().vmem_capacity_bytes)
    except Exception:
        return 128 * 1024 * 1024


def multi_head_self_attention(x, params, *, num_heads, q_tile=None,
                              compute_dtype=jnp.bfloat16):
    """Forward pass matching the PyTorch MultiHeadSelfAttention module.

    compute_dtype controls the MXU matmul operand dtype (accumulation and
    softmax statistics are always f32).  Default bf16 is the native MXU width;
    pass jnp.float32 to exactly reproduce the module's f32 numerics.
    """
    B, S, H = x.shape
    assert H % num_heads == 0
    depth = H // num_heads
    wq, bq, wk, bk, wv, bv, wf, bf = params
    compute_dtype = jnp.dtype(compute_dtype)
    cd = compute_dtype.itemsize
    out_b = jnp.dtype(x.dtype).itemsize
    scale = 1.0 / math.sqrt(float(depth))

    # --- one-time wrapper-side layout plumbing (no in-kernel weight work) ---
    wq_t = (wq.T * scale).astype(compute_dtype)                   # (H, H), scale folded
    bq_s = (bq * scale).reshape(1, H).astype(jnp.float32)
    wkv_t = jnp.concatenate([wk.T, wv.T], axis=1).astype(compute_dtype)   # (H, 2H)
    bkv = jnp.concatenate([bk, bv]).reshape(1, 2 * H).astype(jnp.float32)
    wf_t = wf.T.astype(compute_dtype)                             # (H, H)
    bf2 = bf.reshape(1, H).astype(jnp.float32)
    x_c = x.astype(compute_dtype)

    # --- generation-aware VMEM budget + budget-driven query tile ---
    phys_vmem = _tpu_vmem_capacity_bytes()
    if phys_vmem <= 64 * 2**20:
        vmem_cap = 52 * 2**20       # v7x: leave headroom for compiler scratch
    else:
        vmem_cap = 104 * 2**20      # v5e / v6e: 128 MiB physical

    weight_bytes = 4 * H * H * cd + 4 * H * 4   # single-buffered weights + biases

    def vmem_estimate(t):
        return (
            2 * S * H * cd                                  # x slab (double-buffered)
            + weight_bytes
            + 2 * t * H * out_b                             # output tile (double-buffered)
            + 2 * num_heads * S * max(depth, 128) * cd      # head-major K/V scratch
            + 2 * S * H * 4                                 # KV projection f32 temp
            + t * H * (4 + cd)                              # q
            + (2 * 4 + cd) * num_heads * t * S              # logits + p + p cast
            + num_heads * t * max(depth, 128) * (4 + cd)    # ctx
            + t * H * (cd + 4)                              # ctx_flat + out f32
        )

    if q_tile is None:
        cands = sorted({t for t in (S, 2048, 1024, 512, 256, 128, 64, 32, 16, 8)
                        if t <= S and (t == S or (S % t == 0 and t % 8 == 0))},
                       reverse=True)
        q_tile = cands[-1]
        for t in cands:
            if int(1.25 * vmem_estimate(t)) <= vmem_cap:
                q_tile = t
                break
        # TODO(synk): if even the smallest tile overflows (huge num_heads * S),
        # switch the inner attention to a streamed-KV flash loop.
    if S % q_tile != 0 or (q_tile != S and q_tile % 8 != 0):
        q_tile = S
    n_q = S // q_tile

    vmem_limit = int(min(vmem_cap,
                         max(32 * 2**20, int(1.25 * vmem_estimate(q_tile)))))

    # Cost estimate reflects single K/V projection per batch row (no recompute).
    flops = (2 * B * S * H * H                    # Q projection
             + 2 * B * S * H * 2 * H              # fused K|V projection
             + 4 * B * num_heads * S * S * depth  # QK^T and PV
             + 2 * B * S * H * H)                 # output projection
    cost = pl.CostEstimate(
        flops=flops,
        transcendentals=B * num_heads * S * S,
        bytes_accessed=int(B * S * H * (cd + out_b) + 4 * H * H * cd),
    )

    kernel = partial(mhsa_kernel, num_heads=num_heads, depth=depth,
                     s_q=q_tile, compute_dtype=compute_dtype)

    def _weight_spec(shape, single_buffer):
        idx = lambda b, qi: (0,) * len(shape)
        if single_buffer:
            # Constant-index operands: a single VMEM buffer is enough.
            return pl.BlockSpec(shape, idx, pipeline_mode=pl.Buffered(1))
        return pl.BlockSpec(shape, idx)

    def _build(single_buffer_weights):
        in_specs = [
            # Full-sequence slab; block index constant across qi, so it is
            # DMA'd once per batch row, not once per query tile.
            pl.BlockSpec((1, S, H), lambda b, qi: (b, 0, 0)),
            _weight_spec((H, H), single_buffer_weights),        # wq (scaled)
            _weight_spec((1, H), single_buffer_weights),        # bq (scaled)
            _weight_spec((H, 2 * H), single_buffer_weights),    # wkv
            _weight_spec((1, 2 * H), single_buffer_weights),    # bkv
            _weight_spec((H, H), single_buffer_weights),        # wf
            _weight_spec((1, H), single_buffer_weights),        # bf
        ]
        return pl.pallas_call(
            kernel,
            out_shape=jax.ShapeDtypeStruct((B, S, H), x.dtype),
            grid_spec=pltpu.PrefetchScalarGridSpec(
                num_scalar_prefetch=0,
                grid=(B, n_q),
                in_specs=in_specs,
                out_specs=pl.BlockSpec((1, q_tile, H), lambda b, qi: (b, qi, 0)),
                scratch_shapes=[
                    pltpu.VMEM((num_heads, S, depth), compute_dtype),  # K head-major
                    pltpu.VMEM((num_heads, S, depth), compute_dtype),  # V head-major
                ],
            ),
            compiler_params=pltpu.CompilerParams(
                # Batch axis stays "parallel" (megacore split on v7x); qi must
                # be "arbitrary" because K/V scratch is carried across tiles.
                # TODO(synk): when B == 1, add a head-split parallel axis so
                # the v7x megacore split is not lost.
                dimension_semantics=("parallel", "arbitrary"),
                vmem_limit_bytes=vmem_limit,
            ),
            cost_estimate=cost,
        )

    operands = (x_c, wq_t, bq_s, wkv_t, bkv, wf_t, bf2)
    try:
        return jax.block_until_ready(_build(True)(*operands))
    except Exception:
        # Fallback for jax builds where pipeline_mode=pl.Buffered is not
        # supported on pallas_call BlockSpecs (correctness is identical).
        return jax.block_until_ready(_build(False)(*operands))


def reference_mhsa(x, params, *, num_heads):
    """Pure-JAX reference mirroring the PyTorch forward."""
    wq, bq, wk, bk, wv, bv, wf, bf = params
    B, S, H = x.shape
    depth = H // num_heads

    def split_heads(t):
        return t.reshape(B, S, num_heads, depth).transpose(0, 2, 1, 3)

    q = split_heads(x @ wq.T + bq)
    k = split_heads(x @ wk.T + bk)
    v = split_heads(x @ wv.T + bv)
    logits = jnp.einsum("bhqd,bhkd->bhqk", q, k) / jnp.sqrt(jnp.float32(depth))
    w = jax.nn.softmax(logits, axis=-1)
    out = jnp.einsum("bhqk,bhkd->bhqd", w, v)
    out = out.transpose(0, 2, 1, 3).reshape(B, S, H)
    return out @ wf.T + bf


if __name__ == "__main__":
    B, S, H = 2, 8, 32
    num_heads = 4

    key = jax.random.PRNGKey(0)
    keys = jax.random.split(key, 9)
    x = jax.random.normal(keys[0], (B, S, H), dtype=jnp.float32)

    def init_linear(kw, kb):
        # deterministic synthetic init (nn.Linear shape conventions: [out, in])
        w = jax.random.normal(kw, (H, H), dtype=jnp.float32) * 0.05
        b = jax.random.normal(kb, (H,), dtype=jnp.float32) * 0.01
        return w, b

    wq, bq = init_linear(keys[1], keys[2])
    wk, bk = init_linear(keys[3], keys[4])
    wv, bv = init_linear(keys[5], keys[6])
    wf, bf = init_linear(keys[7], keys[8])
    params = (wq, bq, wk, bk, wv, bv, wf, bf)

    ref = reference_mhsa(x, params, num_heads=num_heads)

    # Exact-numerics path (f32 MXU operands) — matches the PyTorch module.
    out_f32 = multi_head_self_attention(x, params, num_heads=num_heads,
                                        compute_dtype=jnp.float32)
    out_f32 = jax.block_until_ready(out_f32)
    assert out_f32.shape == (B, S, H)
    assert jnp.allclose(out_f32, ref, atol=1e-4, rtol=1e-4), "f32 mismatch vs reference"

    # Default fast path: bf16 MXU operands, f32 accumulation + f32 softmax stats.
    out_bf16 = multi_head_self_attention(x, params, num_heads=num_heads)
    out_bf16 = jax.block_until_ready(out_bf16)
    assert out_bf16.shape == (B, S, H)
    assert jnp.allclose(out_bf16, ref, atol=3e-2, rtol=3e-2), "bf16 mismatch vs reference"

    print("KERNEL_OK")
</pallas_src>

<mosaic_0001>
module attributes {stable_mosaic.version = 11 : i64} {
  func.func @mhsa_kernel(%arg0: i32, %arg1: i32, %arg2: memref<1x8x32xf32, #tpu.memory_space<vmem>>, %arg3: memref<32x32xf32, #tpu.memory_space<vmem>>, %arg4: memref<1x32xf32, #tpu.memory_space<vmem>>, %arg5: memref<32x64xf32, #tpu.memory_space<vmem>>, %arg6: memref<1x64xf32, #tpu.memory_space<vmem>>, %arg7: memref<32x32xf32, #tpu.memory_space<vmem>>, %arg8: memref<1x32xf32, #tpu.memory_space<vmem>>, %arg9: memref<1x8x32xf32, #tpu.memory_space<vmem>>, %arg10: memref<4x8x8xf32, #tpu.memory_space<vmem>>, %arg11: memref<4x8x8xf32, #tpu.memory_space<vmem>>) attributes {dimension_semantics = [#tpu.dimension_semantics<parallel>, #tpu.dimension_semantics<arbitrary>], iteration_bounds = array<i64: 2, 1>, scalar_prefetch = 0 : i64, scratch_operands = 2 : i64, tpu.core_type = #tpu.core_type<tc>, window_params = [{transform_indices = @transform_0, window_bounds = array<i64: 1, 8, 32>}, {pipeline_mode = #tpu.pipeline_mode<synchronous>, transform_indices = @transform_1, window_bounds = array<i64: 32, 32>}, {pipeline_mode = #tpu.pipeline_mode<synchronous>, transform_indices = @transform_2, window_bounds = array<i64: 1, 32>}, {pipeline_mode = #tpu.pipeline_mode<synchronous>, transform_indices = @transform_3, window_bounds = array<i64: 32, 64>}, {pipeline_mode = #tpu.pipeline_mode<synchronous>, transform_indices = @transform_4, window_bounds = array<i64: 1, 64>}, {pipeline_mode = #tpu.pipeline_mode<synchronous>, transform_indices = @transform_5, window_bounds = array<i64: 32, 32>}, {pipeline_mode = #tpu.pipeline_mode<synchronous>, transform_indices = @transform_6, window_bounds = array<i64: 1, 32>}, {transform_indices = @transform_7, window_bounds = array<i64: 1, 8, 32>}]} {
    %c0_i32 = arith.constant 0 : i32
    %0 = arith.cmpi eq, %arg1, %c0_i32 : i32
    %1 = arith.extui %0 : i1 to i32
    %c0_i32_0 = arith.constant 0 : i32
    %2 = arith.cmpi ne, %1, %c0_i32_0 : i32
    scf.if %2 {
      %c0_24 = arith.constant 0 : index
      %c0_25 = arith.constant 0 : index
      %c0_26 = arith.constant 0 : index
      %39 = vector.load %arg2[%c0_24, %c0_25, %c0_26] : memref<1x8x32xf32, #tpu.memory_space<vmem>>, vector<1x8x32xf32>
      %40 = vector.shape_cast %39 : vector<1x8x32xf32> to vector<8x32xf32>
      %c0_27 = arith.constant 0 : index
      %c0_28 = arith.constant 0 : index
      %41 = vector.load %arg5[%c0_27, %c0_28] : memref<32x64xf32, #tpu.memory_space<vmem>>, vector<32x64xf32>
      %cst_29 = arith.constant dense<0.000000e+00> : vector<8x64xf32>
      %42 = tpu.matmul %40, %41, %cst_29 {dimension_numbers = #tpu.dot_dimension_numbers<[1], [0], [0], [1], [0, 0, 1, 1], [], []>} : vector<8x32xf32>, vector<32x64xf32>, vector<8x64xf32> -> vector<8x64xf32>
      %c0_30 = arith.constant 0 : index
      %c0_31 = arith.constant 0 : index
      %43 = vector.load %arg6[%c0_30, %c0_31] : memref<1x64xf32, #tpu.memory_space<vmem>>, vector<1x64xf32>
      %44 = vector.broadcast %43 : vector<1x64xf32> to vector<8x64xf32>
      %45 = arith.addf %42, %44 : vector<8x64xf32>
      %46 = vector.extract_strided_slice %45 {offsets = [0, 0], sizes = [8, 32], strides = [1, 1]} : vector<8x64xf32> to vector<8x32xf32>
      %47 = vector.extract_strided_slice %45 {offsets = [0, 32], sizes = [8, 32], strides = [1, 1]} : vector<8x64xf32> to vector<8x32xf32>
      %48 = vector.shape_cast %46 : vector<8x32xf32> to vector<8x4x8xf32>
      %49 = tpu.transpose %48, [1, 0, 2] : vector<8x4x8xf32> -> vector<4x8x8xf32>
      %c0_32 = arith.constant 0 : index
      %c0_33 = arith.constant 0 : index
      %c0_34 = arith.constant 0 : index
      %50 = vector.load %arg10[%c0_32, %c0_33, %c0_34] : memref<4x8x8xf32, #tpu.memory_space<vmem>>, vector<4x8x8xf32>
      tpu.vector_store %arg10[%c0_32, %c0_33, %c0_34], %49 {strides = array<i32>} : memref<4x8x8xf32, #tpu.memory_space<vmem>>, vector<4x8x8xf32>,
      %51 = vector.shape_cast %47 : vector<8x32xf32> to vector<8x4x8xf32>
      %52 = tpu.transpose %51, [1, 0, 2] : vector<8x4x8xf32> -> vector<4x8x8xf32>
      %c0_35 = arith.constant 0 : index
      %c0_36 = arith.constant 0 : index
      %c0_37 = arith.constant 0 : index
      %53 = vector.load %arg11[%c0_35, %c0_36, %c0_37] : memref<4x8x8xf32, #tpu.memory_space<vmem>>, vector<4x8x8xf32>
      tpu.vector_store %arg11[%c0_35, %c0_36, %c0_37], %52 {strides = array<i32>} : memref<4x8x8xf32, #tpu.memory_space<vmem>>, vector<4x8x8xf32>,
    } else {
    }
    %c8_i32 = arith.constant 8 : i32
    %3 = arith.muli %arg1, %c8_i32 : i32
    %4 = tpu.assume_multiple %3, 8 : i32
    %c0 = arith.constant 0 : index
    %5 = arith.index_cast %4 : i32 to index
    %c0_1 = arith.constant 0 : index
    %6 = vector.load %arg2[%c0, %5, %c0_1] : memref<1x8x32xf32, #tpu.memory_space<vmem>>, vector<1x8x32xf32>
    %7 = vector.shape_cast %6 : vector<1x8x32xf32> to vector<8x32xf32>
    %c0_2 = arith.constant 0 : index
    %c0_3 = arith.constant 0 : index
    %8 = vector.load %arg3[%c0_2, %c0_3] : memref<32x32xf32, #tpu.memory_space<vmem>>, vector<32x32xf32>
    %cst = arith.constant dense<0.000000e+00> : vector<8x32xf32>
    %9 = tpu.matmul %7, %8, %cst {dimension_numbers = #tpu.dot_dimension_numbers<[1], [0], [0], [1], [0, 0, 1, 1], [], []>} : vector<8x32xf32>, vector<32x32xf32>, vector<8x32xf32> -> vector<8x32xf32>
    %c0_4 = arith.constant 0 : index
    %c0_5 = arith.constant 0 : index
    %10 = vector.load %arg4[%c0_4, %c0_5] : memref<1x32xf32, #tpu.memory_space<vmem>>, vector<1x32xf32>
    %11 = vector.broadcast %10 : vector<1x32xf32> to vector<8x32xf32>
    %12 = arith.addf %9, %11 : vector<8x32xf32>
    %13 = vector.shape_cast %12 : vector<8x32xf32> to vector<8x4x8xf32>
    %14 = tpu.transpose %13, [1, 0, 2] : vector<8x4x8xf32> -> vector<4x8x8xf32>
    %c0_6 = arith.constant 0 : index
    %c0_7 = arith.constant 0 : index
    %c0_8 = arith.constant 0 : index
    %15 = vector.load %arg10[%c0_6, %c0_7, %c0_8] : memref<4x8x8xf32, #tpu.memory_space<vmem>>, vector<4x8x8xf32>
    "tpu.trace_start"() <{level = 10 : i32, message = "hqd,hkd->hqk"}> : () -> ()
    %cst_9 = arith.constant dense<0.000000e+00> : vector<4x8x8xf32>
    %16 = tpu.matmul %14, %15, %cst_9 {dimension_numbers = #tpu.dot_dimension_numbers<[2], [2], [1], [1], [0, 0, 0, 1, 1, 1], [0], [0]>} : vector<4x8x8xf32>, vector<4x8x8xf32>, vector<4x8x8xf32> -> vector<4x8x8xf32>
    "tpu.trace_stop"() : () -> ()
    %cst_10 = arith.constant dense<0xFF800000> : vector<4x8xf32>
    %17 = vector.multi_reduction <maximumf>, %16, %cst_10 [2] : vector<4x8x8xf32> to vector<4x8xf32>
    %18 = vector.shape_cast %17 : vector<4x8xf32> to vector<4x8x1xf32>
    %19 = vector.broadcast %18 : vector<4x8x1xf32> to vector<4x8x8xf32>
    %20 = arith.subf %16, %19 : vector<4x8x8xf32>
    %21 = math.exp %20 : vector<4x8x8xf32>
    %cst_11 = arith.constant dense<0.000000e+00> : vector<4x8xf32>
    %22 = vector.multi_reduction <add>, %21, %cst_11 [2] : vector<4x8x8xf32> to vector<4x8xf32>
    %23 = vector.shape_cast %22 : vector<4x8xf32> to vector<4x8x1xf32>
    %c0_12 = arith.constant 0 : index
    %c0_13 = arith.constant 0 : index
    %c0_14 = arith.constant 0 : index
    %24 = vector.load %arg11[%c0_12, %c0_13, %c0_14] : memref<4x8x8xf32, #tpu.memory_space<vmem>>, vector<4x8x8xf32>
    "tpu.trace_start"() <{level = 10 : i32, message = "hqk,hkd->hqd"}> : () -> ()
    %cst_15 = arith.constant dense<0.000000e+00> : vector<4x8x8xf32>
    %25 = tpu.matmul %21, %24, %cst_15 {dimension_numbers = #tpu.dot_dimension_numbers<[2], [1], [1], [2], [0, 0, 0, 1, 1, 2], [0], [0]>} : vector<4x8x8xf32>, vector<4x8x8xf32>, vector<4x8x8xf32> -> vector<4x8x8xf32>
    "tpu.trace_stop"() : () -> ()
    %26 = tpu.reciprocal %23 : vector<4x8x1xf32> -> vector<4x8x1xf32>
    %27 = vector.broadcast %26 : vector<4x8x1xf32> to vector<4x8x8xf32>
    %28 = arith.mulf %25, %27 : vector<4x8x8xf32>
    %29 = tpu.transpose %28, [1, 0, 2] : vector<4x8x8xf32> -> vector<8x4x8xf32>
    %30 = vector.shape_cast %29 : vector<8x4x8xf32> to vector<8x32xf32>
    %c0_16 = arith.constant 0 : index
    %c0_17 = arith.constant 0 : index
    %31 = vector.load %arg7[%c0_16, %c0_17] : memref<32x32xf32, #tpu.memory_space<vmem>>, vector<32x32xf32>
    %cst_18 = arith.constant dense<0.000000e+00> : vector<8x32xf32>
    %32 = tpu.matmul %30, %31, %cst_18 {dimension_numbers = #tpu.dot_dimension_numbers<[1], [0], [0], [1], [0, 0, 1, 1], [], []>} : vector<8x32xf32>, vector<32x32xf32>, vector<8x32xf32> -> vector<8x32xf32>
    %c0_19 = arith.constant 0 : index
    %c0_20 = arith.constant 0 : index
    %33 = vector.load %arg8[%c0_19, %c0_20] : memref<1x32xf32, #tpu.memory_space<vmem>>, vector<1x32xf32>
    %34 = vector.broadcast %33 : vector<1x32xf32> to vector<8x32xf32>
    %35 = arith.addf %32, %34 : vector<8x32xf32>
    %c0_21 = arith.constant 0 : index
    %c0_22 = arith.constant 0 : index
    %c0_23 = arith.constant 0 : index
    %36 = vector.load %arg9[%c0_21, %c0_22, %c0_23] : memref<1x8x32xf32, #tpu.memory_space<vmem>>, vector<1x8x32xf32>
    %37 = vector.shape_cast %36 : vector<1x8x32xf32> to vector<8x32xf32>
    %38 = vector.shape_cast %35 : vector<8x32xf32> to vector<1x8x32xf32>
    tpu.vector_store %arg9[%c0_21, %c0_22, %c0_23], %38 {strides = array<i32>} : memref<1x8x32xf32, #tpu.memory_space<vmem>>, vector<1x8x32xf32>,
    return
  }
  func.func @transform_0(%arg0: i32, %arg1: i32) -> (i32, i32, i32) {
    %c0_i32 = arith.constant 0 : i32
    %c0_i32_0 = arith.constant 0 : i32
    %c0_i32_1 = arith.constant 0 : i32
    return %arg0, %c0_i32, %c0_i32_0 : i32, i32, i32
  }
  func.func @transform_1(%arg0: i32, %arg1: i32) -> (i32, i32) {
    %c0_i32 = arith.constant 0 : i32
    %c0_i32_0 = arith.constant 0 : i32
    %c0_i32_1 = arith.constant 0 : i32
    return %c0_i32, %c0_i32_0 : i32, i32
  }
  func.func @transform_2(%arg0: i32, %arg1: i32) -> (i32, i32) {
    %c0_i32 = arith.constant 0 : i32
    %c0_i32_0 = arith.constant 0 : i32
    %c0_i32_1 = arith.constant 0 : i32
    return %c0_i32, %c0_i32_0 : i32, i32
  }
  func.func @transform_3(%arg0: i32, %arg1: i32) -> (i32, i32) {
    %c0_i32 = arith.constant 0 : i32
    %c0_i32_0 = arith.constant 0 : i32
    %c0_i32_1 = arith.constant 0 : i32
    return %c0_i32, %c0_i32_0 : i32, i32
  }
  func.func @transform_4(%arg0: i32, %arg1: i32) -> (i32, i32) {
    %c0_i32 = arith.constant 0 : i32
    %c0_i32_0 = arith.constant 0 : i32
    %c0_i32_1 = arith.constant 0 : i32
    return %c0_i32, %c0_i32_0 : i32, i32
  }
  func.func @transform_5(%arg0: i32, %arg1: i32) -> (i32, i32) {
    %c0_i32 = arith.constant 0 : i32
    %c0_i32_0 = arith.constant 0 : i32
    %c0_i32_1 = arith.constant 0 : i32
    return %c0_i32, %c0_i32_0 : i32, i32
  }
  func.func @transform_6(%arg0: i32, %arg1: i32) -> (i32, i32) {
    %c0_i32 = arith.constant 0 : i32
    %c0_i32_0 = arith.constant 0 : i32
    %c0_i32_1 = arith.constant 0 : i32
    return %c0_i32, %c0_i32_0 : i32, i32
  }
  func.func @transform_7(%arg0: i32, %arg1: i32) -> (i32, i32, i32) {
    %c0_i32 = arith.constant 0 : i32
    %c0_i32_0 = arith.constant 0 : i32
    return %arg0, %arg1, %c0_i32 : i32, i32, i32
  }
}

module attributes {stable_mosaic.version = 11 : i64} {
  func.func @mhsa_kernel(%arg0: i32, %arg1: i32, %arg2: memref<1x8x32xf32, #tpu.memory_space<vmem>>, %arg3: memref<32x32xf32, #tpu.memory_space<vmem>>, %arg4: memref<1x32xf32, #tpu.memory_space<vmem>>, %arg5: memref<32x64xf32, #tpu.memory_space<vmem>>, %arg6: memref<1x64xf32, #tpu.memory_space<vmem>>, %arg7: memref<32x32xf32, #tpu.memory_space<vmem>>, %arg8: memref<1x32xf32, #tpu.memory_space<vmem>>, %arg9: memref<1x8x32xf32, #tpu.memory_space<vmem>>, %arg10: memref<4x8x8xf32, #tpu.memory_space<vmem>>, %arg11: memref<4x8x8xf32, #tpu.memory_space<vmem>>) attributes {dimension_semantics = [#tpu.dimension_semantics<parallel>, #tpu.dimension_semantics<arbitrary>], iteration_bounds = array<i64: 2, 1>, scalar_prefetch = 0 : i64, scratch_operands = 2 : i64, tpu.core_type = #tpu.core_type<tc>, window_params = [{transform_indices = @transform_0, window_bounds = array<i64: 1, 8, 32>}, {pipeline_mode = #tpu.pipeline_mode<synchronous>, transform_indices = @transform_1, window_bounds = array<i64: 32, 32>}, {pipeline_mode = #tpu.pipeline_mode<synchronous>, transform_indices = @transform_2, window_bounds = array<i64: 1, 32>}, {pipeline_mode = #tpu.pipeline_mode<synchronous>, transform_indices = @transform_3, window_bounds = array<i64: 32, 64>}, {pipeline_mode = #tpu.pipeline_mode<synchronous>, transform_indices = @transform_4, window_bounds = array<i64: 1, 64>}, {pipeline_mode = #tpu.pipeline_mode<synchronous>, transform_indices = @transform_5, window_bounds = array<i64: 32, 32>}, {pipeline_mode = #tpu.pipeline_mode<synchronous>, transform_indices = @transform_6, window_bounds = array<i64: 1, 32>}, {transform_indices = @transform_7, window_bounds = array<i64: 1, 8, 32>}]} {
    %c0_i32 = arith.constant 0 : i32
    %0 = arith.cmpi eq, %arg1, %c0_i32 : i32
    %1 = arith.extui %0 : i1 to i32
    %c0_i32_0 = arith.constant 0 : i32
    %2 = arith.cmpi ne, %1, %c0_i32_0 : i32
    scf.if %2 {
      %c0_24 = arith.constant 0 : index
      %c0_25 = arith.constant 0 : index
      %c0_26 = arith.constant 0 : index
      %39 = vector.load %arg2[%c0_24, %c0_25, %c0_26] : memref<1x8x32xf32, #tpu.memory_space<vmem>>, vector<1x8x32xf32>
      %40 = vector.shape_cast %39 : vector<1x8x32xf32> to vector<8x32xf32>
      %c0_27 = arith.constant 0 : index
      %c0_28 = arith.constant 0 : index
      %41 = vector.load %arg5[%c0_27, %c0_28] : memref<32x64xf32, #tpu.memory_space<vmem>>, vector<32x64xf32>
      %cst_29 = arith.constant dense<0.000000e+00> : vector<8x64xf32>
      %42 = tpu.matmul %40, %41, %cst_29 {dimension_numbers = #tpu.dot_dimension_numbers<[1], [0], [0], [1], [0, 0, 1, 1], [], []>} : vector<8x32xf32>, vector<32x64xf32>, vector<8x64xf32> -> vector<8x64xf32>
      %c0_30 = arith.constant 0 : index
      %c0_31 = arith.constant 0 : index
      %43 = vector.load %arg6[%c0_30, %c0_31] : memref<1x64xf32, #tpu.memory_space<vmem>>, vector<1x64xf32>
      %44 = vector.broadcast %43 : vector<1x64xf32> to vector<8x64xf32>
      %45 = arith.addf %42, %44 : vector<8x64xf32>
      %46 = vector.extract_strided_slice %45 {offsets = [0, 0], sizes = [8, 32], strides = [1, 1]} : vector<8x64xf32> to vector<8x32xf32>
      %47 = vector.extract_strided_slice %45 {offsets = [0, 32], sizes = [8, 32], strides = [1, 1]} : vector<8x64xf32> to vector<8x32xf32>
      %48 = vector.shape_cast %46 : vector<8x32xf32> to vector<8x4x8xf32>
      %49 = tpu.transpose %48, [1, 0, 2] : vector<8x4x8xf32> -> vector<4x8x8xf32>
      %c0_32 = arith.constant 0 : index
      %c0_33 = arith.constant 0 : index
      %c0_34 = arith.constant 0 : index
      %50 = vector.load %arg10[%c0_32, %c0_33, %c0_34] : memref<4x8x8xf32, #tpu.memory_space<vmem>>, vector<4x8x8xf32>
      tpu.vector_store %arg10[%c0_32, %c0_33, %c0_34], %49 {strides = array<i32>} : memref<4x8x8xf32, #tpu.memory_space<vmem>>, vector<4x8x8xf32>,
      %51 = vector.shape_cast %47 : vector<8x32xf32> to vector<8x4x8xf32>
      %52 = tpu.transpose %51, [1, 0, 2] : vector<8x4x8xf32> -> vector<4x8x8xf32>
      %c0_35 = arith.constant 0 : index
      %c0_36 = arith.constant 0 : index
      %c0_37 = arith.constant 0 : index
      %53 = vector.load %arg11[%c0_35, %c0_36, %c0_37] : memref<4x8x8xf32, #tpu.memory_space<vmem>>, vector<4x8x8xf32>
      tpu.vector_store %arg11[%c0_35, %c0_36, %c0_37], %52 {strides = array<i32>} : memref<4x8x8xf32, #tpu.memory_space<vmem>>, vector<4x8x8xf32>,
    } else {
    }
    %c8_i32 = arith.constant 8 : i32
    %3 = arith.muli %arg1, %c8_i32 : i32
    %4 = tpu.assume_multiple %3, 8 : i32
    %c0 = arith.constant 0 : index
    %5 = arith.index_cast %4 : i32 to index
    %c0_1 = arith.constant 0 : index
    %6 = vector.load %arg2[%c0, %5, %c0_1] : memref<1x8x32xf32, #tpu.memory_space<vmem>>, vector<1x8x32xf32>
    %7 = vector.shape_cast %6 : vector<1x8x32xf32> to vector<8x32xf32>
    %c0_2 = arith.constant 0 : index
    %c0_3 = arith.constant 0 : index
    %8 = vector.load %arg3[%c0_2, %c0_3] : memref<32x32xf32, #tpu.memory_space<vmem>>, vector<32x32xf32>
    %cst = arith.constant dense<0.000000e+00> : vector<8x32xf32>
    %9 = tpu.matmul %7, %8, %cst {dimension_numbers = #tpu.dot_dimension_numbers<[1], [0], [0], [1], [0, 0, 1, 1], [], []>} : vector<8x32xf32>, vector<32x32xf32>, vector<8x32xf32> -> vector<8x32xf32>
    %c0_4 = arith.constant 0 : index
    %c0_5 = arith.constant 0 : index
    %10 = vector.load %arg4[%c0_4, %c0_5] : memref<1x32xf32, #tpu.memory_space<vmem>>, vector<1x32xf32>
    %11 = vector.broadcast %10 : vector<1x32xf32> to vector<8x32xf32>
    %12 = arith.addf %9, %11 : vector<8x32xf32>
    %13 = vector.shape_cast %12 : vector<8x32xf32> to vector<8x4x8xf32>
    %14 = tpu.transpose %13, [1, 0, 2] : vector<8x4x8xf32> -> vector<4x8x8xf32>
    %c0_6 = arith.constant 0 : index
    %c0_7 = arith.constant 0 : index
    %c0_8 = arith.constant 0 : index
    %15 = vector.load %arg10[%c0_6, %c0_7, %c0_8] : memref<4x8x8xf32, #tpu.memory_space<vmem>>, vector<4x8x8xf32>
    "tpu.trace_start"() <{level = 10 : i32, message = "hqd,hkd->hqk"}> : () -> ()
    %cst_9 = arith.constant dense<0.000000e+00> : vector<4x8x8xf32>
    %16 = tpu.matmul %14, %15, %cst_9 {dimension_numbers = #tpu.dot_dimension_numbers<[2], [2], [1], [1], [0, 0, 0, 1, 1, 1], [0], [0]>} : vector<4x8x8xf32>, vector<4x8x8xf32>, vector<4x8x8xf32> -> vector<4x8x8xf32>
    "tpu.trace_stop"() : () -> ()
    %cst_10 = arith.constant dense<0xFF800000> : vector<4x8xf32>
    %17 = vector.multi_reduction <maximumf>, %16, %cst_10 [2] : vector<4x8x8xf32> to vector<4x8xf32>
    %18 = vector.shape_cast %17 : vector<4x8xf32> to vector<4x8x1xf32>
    %19 = vector.broadcast %18 : vector<4x8x1xf32> to vector<4x8x8xf32>
    %20 = arith.subf %16, %19 : vector<4x8x8xf32>
    %21 = math.exp %20 : vector<4x8x8xf32>
    %cst_11 = arith.constant dense<0.000000e+00> : vector<4x8xf32>
    %22 = vector.multi_reduction <add>, %21, %cst_11 [2] : vector<4x8x8xf32> to vector<4x8xf32>
    %23 = vector.shape_cast %22 : vector<4x8xf32> to vector<4x8x1xf32>
    %c0_12 = arith.constant 0 : index
    %c0_13 = arith.constant 0 : index
    %c0_14 = arith.constant 0 : index
    %24 = vector.load %arg11[%c0_12, %c0_13, %c0_14] : memref<4x8x8xf32, #tpu.memory_space<vmem>>, vector<4x8x8xf32>
    "tpu.trace_start"() <{level = 10 : i32, message = "hqk,hkd->hqd"}> : () -> ()
    %cst_15 = arith.constant dense<0.000000e+00> : vector<4x8x8xf32>
    %25 = tpu.matmul %21, %24, %cst_15 {dimension_numbers = #tpu.dot_dimension_numbers<[2], [1], [1], [2], [0, 0, 0, 1, 1, 2], [0], [0]>} : vector<4x8x8xf32>, vector<4x8x8xf32>, vector<4x8x8xf32> -> vector<4x8x8xf32>
    "tpu.trace_stop"() : () -> ()
    %26 = tpu.reciprocal %23 : vector<4x8x1xf32> -> vector<4x8x1xf32>
    %27 = vector.broadcast %26 : vector<4x8x1xf32> to vector<4x8x8xf32>
    %28 = arith.mulf %25, %27 : vector<4x8x8xf32>
    %29 = tpu.transpose %28, [1, 0, 2] : vector<4x8x8xf32> -> vector<8x4x8xf32>
    %30 = vector.shape_cast %29 : vector<8x4x8xf32> to vector<8x32xf32>
    %c0_16 = arith.constant 0 : index
    %c0_17 = arith.constant 0 : index
    %31 = vector.load %arg7[%c0_16, %c0_17] : memref<32x32xf32, #tpu.memory_space<vmem>>, vector<32x32xf32>
    %cst_18 = arith.constant dense<0.000000e+00> : vector<8x32xf32>
    %32 = tpu.matmul %30, %31, %cst_18 {dimension_numbers = #tpu.dot_dimension_numbers<[1], [0], [0], [1], [0, 0, 1, 1], [], []>} : vector<8x32xf32>, vector<32x32xf32>, vector<8x32xf32> -> vector<8x32xf32>
    %c0_19 = arith.constant 0 : index
    %c0_20 = arith.constant 0 : index
    %33 = vector.load %arg8[%c0_19, %c0_20] : memref<1x32xf32, #tpu.memory_space<vmem>>, vector<1x32xf32>
    %34 = vector.broadcast %33 : vector<1x32xf32> to vector<8x32xf32>
    %35 = arith.addf %32, %34 : vector<8x32xf32>
    %c0_21 = arith.constant 0 : index
    %c0_22 = arith.constant 0 : index
    %c0_23 = arith.constant 0 : index
    %36 = vector.load %arg9[%c0_21, %c0_22, %c0_23] : memref<1x8x32xf32, #tpu.memory_space<vmem>>, vector<1x8x32xf32>
    %37 = vector.shape_cast %36 : vector<1x8x32xf32> to vector<8x32xf32>
    %38 = vector.shape_cast %35 : vector<8x32xf32> to vector<1x8x32xf32>
    tpu.vector_store %arg9[%c0_21, %c0_22, %c0_23], %38 {strides = array<i32>} : memref<1x8x32xf32, #tpu.memory_space<vmem>>, vector<1x8x32xf32>,
    return
  }
  func.func @transform_0(%arg0: i32, %arg1: i32) -> (i32, i32, i32) {
    %c0_i32 = arith.constant 0 : i32
    %c0_i32_0 = arith.constant 0 : i32
    %c0_i32_1 = arith.constant 0 : i32
    return %arg0, %c0_i32, %c0_i32_0 : i32, i32, i32
  }
  func.func @transform_1(%arg0: i32, %arg1: i32) -> (i32, i32) {
    %c0_i32 = arith.constant 0 : i32
    %c0_i32_0 = arith.constant 0 : i32
    %c0_i32_1 = arith.constant 0 : i32
    return %c0_i32, %c0_i32_0 : i32, i32
  }
  func.func @transform_2(%arg0: i32, %arg1: i32) -> (i32, i32) {
    %c0_i32 = arith.constant 0 : i32
    %c0_i32_0 = arith.constant 0 : i32
    %c0_i32_1 = arith.constant 0 : i32
    return %c0_i32, %c0_i32_0 : i32, i32
  }
  func.func @transform_3(%arg0: i32, %arg1: i32) -> (i32, i32) {
    %c0_i32 = arith.constant 0 : i32
    %c0_i32_0 = arith.constant 0 : i32
    %c0_i32_1 = arith.constant 0 : i32
    return %c0_i32, %c0_i32_0 : i32, i32
  }
  func.func @transform_4(%arg0: i32, %arg1: i32) -> (i32, i32) {
    %c0_i32 = arith.constant 0 : i32
    %c0_i32_0 = arith.constant 0 : i32
    %c0_i32_1 = arith.constant 0 : i32
    return %c0_i32, %c0_i32_0 : i32, i32
  }
  func.func @transform_5(%arg0: i32, %arg1: i32) -> (i32, i32) {
    %c0_i32 = arith.constant 0 : i32
    %c0_i32_0 = arith.constant 0 : i32
    %c0_i32_1 = arith.constant 0 : i32
    return %c0_i32, %c0_i32_0 : i32, i32
  }
  func.func @transform_6(%arg0: i32, %arg1: i32) -> (i32, i32) {
    %c0_i32 = arith.constant 0 : i32
    %c0_i32_0 = arith.constant 0 : i32
    %c0_i32_1 = arith.constant 0 : i32
    return %c0_i32, %c0_i32_0 : i32, i32
  }
  func.func @transform_7(%arg0: i32, %arg1: i32) -> (i32, i32, i32) {
    %c0_i32 = arith.constant 0 : i32
    %c0_i32_0 = arith.constant 0 : i32
    return %arg0, %arg1, %c0_i32 : i32, i32, i32
  }
}

</mosaic_0001>

<bundles_post_ra>
// kernel: tpu_custom_call.1
= control target key start
LH: loop header
LB: loop body
LE: loop exit
PB: predicated region body
PF: predicated region fallthrough
CT: control target
= control target key end

     0   :  { %s2983_s0 = inlined_call_operand.hbm [shape: f32[2,8,32], index: 0, kind: input, shape index: {}]   ;;  %s2984_s1 = inlined_call_operand.hbm [shape: f32[32,32], index: 1, kind: input, shape index: {}]   ;;  %s2985_s2 = inlined_call_operand.vmem [shape: f32[1,32], index: 2, kind: input, shape index: {}]   ;;  %s2986_s3 = inlined_call_operand.hbm [shape: f32[32,64], index: 3, kind: input, shape index: {}]   ;;  %s2987_s4 = inlined_call_operand.vmem [shape: f32[1,64], index: 4, kind: input, shape index: {}]   ;;  %s2988_s5 = inlined_call_operand.hbm [shape: f32[32,32], index: 5, kind: input, shape index: {}]   ;;  %s2989_s6 = inlined_call_operand.vmem [shape: f32[1,32], index: 6, kind: input, shape index: {}]   ;;  %s2990_s7 = inlined_call_operand.hbm [shape: f32[2,8,32], index: 7, kind: output, shape index: {}]  }
   0x1   :  { %2998 = sst [smem:[#allocation19_spill]] %s2989_s6 }
   0x2   :  { %2999 = sst [smem:[#allocation20_spill]] %s2990_s7 }
   0x3   :  { %12 = vsyncpa [#allocation5], 0 }
   0x4   :  { %14 = vsyncpa [#allocation5 + $0x1], 0 }
   0x5   :  { %15 = vsyncpa [#allocation8], 0 }
   0x6   :  { %16 = vsyncpa [#allocation11], 0 }
   0x7   :  { %17 = vsyncpa [#allocation6], 0 }
   0x8   :  { %19 = vsyncpa [#allocation6 + $0x1], 0  ;;  %s2546_s24 = smov 0   ;;  %s2548_s25 = smov 0  }
   0x9   :  { %s2550_s26 = smov 0   ;;  %s2552_s27 = smov 0  }
   0xa   :  { %s2554_s28 = smov 0   ;;  %s2556_s29 = smov 0  }
   0xb LB: > { %3000 = sst [smem:[#allocation17_spill]] %s2465_s24  ;;  %s1991_s30 = sadd.s32 4294967295, %s2485_s29   ;;  %s2485_s29 = sphi %s2556_s29, %s25_s29   ;;  %s2481_s28 = sphi %s2554_s28, %s3025_s28   ;;  %s2477_s27 = sphi %s2552_s27, %s3024_s27   ;;  %s2473_s26 = sphi %s2550_s26, %s3023_s26   ;;  %s2469_s25 = sphi %s2548_s25, %s3022_s25   ;;  %s2465_s24 = sphi %s2546_s24, %s3021_s24  }
   0xc   : > { %s1992_s8 = sadd.s32 4294967294, %s2485_s29   ;;  %p57_p0 = scmp.ne.s32.totalorder %s2469_s25, %s2465_s24 }
   0xd   : > { %p2580_p1 = scmp.eq.s32.totalorder %s1991_s30, 0  ;;  %p2584_p2 = scmp.eq.s32.totalorder %s1991_s30, 1 }
   0xe   : > { %p215_p3 = scmp.eq.s32.totalorder %s1992_s8, 1  ;;  %p1993_p5 = scmp.ge.s32.totalorder %s2485_s29, 1 }
   0xf   : > { %s3001_s9 = scalar_select %p2580_p1, 1, 0 }
  0x10   : > { %s3002_s10 = scalar_select %p2584_p2, 1, 0 }
  0x11   : > { %p2590_p4 = por %p2580_p1, %p57_p0  ;;  %p2595_p6 = por %p215_p3, %p57_p0 }
  0x12   : > { %p222_p7 = scmp.lt.s32.totalorder %s2485_s29, 3  ;;  %s2487_s14 = smov [#allocation7]  }
  0x13   : > { %s3003_s11 = scalar_select %p2590_p4, 1, 0 }
  0x14   : > { %s3004_s12 = scalar_select %p2595_p6, 1, 0 }
  0x15   : > { %p2600_p8 = pnand %p1993_p5, %p222_p7  ;;  %s234_s15 = sshll.u32 %s2487_s14, 4  ;;  %s2604_s15 = int_to_ptr.vmem [resolvable:$true] %s234_s15 }
  0x16   : > { %3005 = sst [smem:[#allocation18_spill]] %s3004_s12  ;;  %s2488_s17 = smov [#allocation9]  }
  0x17   : > { %s3006_s13 = scalar_select %p2600_p8, 1, 0 }
  0x18   : > { %p2174_p9 = pneg %p2600_p8  ;;  %s250_s18 = sshll.u32 %s2488_s17, 4  ;;  %s2615_s18 = int_to_ptr.vmem [resolvable:$true] %s250_s18 }
  0x19   : > { %s2489_s19 = smov [#allocation10]   ;;  %s2281_s23 = scalar_lea.hbm %s2984_s1, 512 }
  0x1a   : > { %p2611_p11 = pnand %p2174_p9, %p2580_p1  ;;  %s2617_s20 = sshll.u32 %s2489_s19, 4  ;;  %s267_s20 = int_to_ptr.vmem [resolvable:$true] %s2617_s20 }
  0x1b   : > { %p2282_p12 = scmp.ne.s32.totalorder %s2984_s1, %s2281_s23  ;;  %p2288_p5 = scmp.lt.u32.totalorder %s2281_s23, %s2984_s1 }
  0x1c   : > { %p2627_p13 = pneg %p2611_p11 }
  0x1e   : > { %p2284_p0 = pnand %p2627_p13, %p2282_p12 }
  0x20   : > { %p2285_p3 = pneg %p2284_p0 }
  0x22   : > { %p2290_p7 = pnand %p2288_p5, %p2285_p3 }
  0x24   : > { %2293 = shalt.err (!%p2290_p7)
}
  0x25   : > { %s2294_s21 = scalar_lea.vmem %s2604_s15, 512  ;;  %p2302_p1 = scmp.lt.s32.totalorder %s2604_s15, %s2604_s15 }
  0x26   : > { %p2295_p9 = scmp.ne.s32.totalorder %s2604_s15, %s2294_s21  ;;  %p2303_p4 = scmp.lt.s32.totalorder %s2294_s21, %s2294_s21 }
  0x28   : > { %p2297_p10 = pnand %p2295_p9, %p2627_p13  ;;  %p2304_p12 = por %p2303_p4, %p2302_p1 }
  0x2a   : > { %p2298_p6 = pneg %p2297_p10 }
  0x2c   : > { %p2305_p0 = pnand %p2304_p12, %p2298_p6 }
  0x2e   : > { %2308 = shalt.err (!%p2305_p0)
}
  0x2f   : > { %s2490_s22 = smov 128   ;;  %s2491_s23 = smov 8  }
  0x30   : > { %2177 = dma.hbm_to_vmem [thread:$0]  (!%p2611_p11), %s2984_s1, 512, %s2604_s15, [#allocation8], %s2490_s22, %s2490_s22, %s2491_s23  }
  0x31   : > { %s2309_s21 = scalar_lea.hbm %s2986_s3, 512 }
  0x32   : > { %p2310_p1 = scmp.ne.s32.totalorder %s2986_s3, %s2309_s21  ;;  %p2316_p10 = scmp.lt.u32.totalorder %s2309_s21, %s2986_s3 }
  0x34   : > { %p2312_p4 = pnand %p2310_p1, %p2627_p13 }
  0x36   : > { %p2313_p6 = pneg %p2312_p4 }
  0x38   : > { %p2318_p3 = pnand %p2316_p10, %p2313_p6 }
  0x3a   : > { %2321 = shalt.err (!%p2318_p3)
}
  0x3b   : > { %s2322_s15 = scalar_lea.vmem %s2615_s18, 512  ;;  %p2330_p12 = scmp.lt.s32.totalorder %s2615_s18, %s2615_s18 }
  0x3c   : > { %p2323_p5 = scmp.ne.s32.totalorder %s2615_s18, %s2322_s15  ;;  %p2331_p0 = scmp.lt.s32.totalorder %s2322_s15, %s2322_s15 }
  0x3e   : > { %p2325_p7 = pnand %p2323_p5, %p2627_p13  ;;  %p2332_p1 = por %p2331_p0, %p2330_p12 }
  0x40   : > { %p2326_p9 = pneg %p2325_p7 }
  0x42   : > { %p2333_p4 = pnand %p2332_p1, %p2326_p9 }
  0x44   : > { %2336 = shalt.err (!%p2333_p4)
}
  0x45   : > { %2180 = dma.hbm_to_vmem [thread:$0]  (!%p2611_p11), %s2986_s3, 512, %s2615_s18, [#allocation8], %s2490_s22, %s2490_s22, %s2491_s23  }
  0x46   : > { %s2337_s30 = scalar_lea.hbm %s2988_s5, 512 }
  0x47   : > { %p2338_p6 = scmp.ne.s32.totalorder %s2988_s5, %s2337_s30  ;;  %p2344_p5 = scmp.lt.u32.totalorder %s2337_s30, %s2988_s5 }
  0x49   : > { %p2340_p10 = pnand %p2338_p6, %p2627_p13 }
  0x4b   : > { %p2341_p3 = pneg %p2340_p10 }
  0x4d   : > { %p2346_p7 = pnand %p2344_p5, %p2341_p3 }
  0x4f   : > { %2349 = shalt.err (!%p2346_p7)
}
  0x50   : > { %s2350_s15 = scalar_lea.vmem %s267_s20, 512  ;;  %p2358_p1 = scmp.lt.s32.totalorder %s267_s20, %s267_s20 }
  0x51   : > { %p2351_p9 = scmp.ne.s32.totalorder %s267_s20, %s2350_s15  ;;  %p2359_p4 = scmp.lt.s32.totalorder %s2350_s15, %s2350_s15 }
  0x53   : > { %p2353_p12 = pnand %p2351_p9, %p2627_p13  ;;  %p2360_p8 = por %p2359_p4, %p2358_p1 }
  0x55   : > { %p2354_p0 = pneg %p2353_p12 }
  0x57   : > { %p2361_p2 = pnand %p2360_p8, %p2354_p0 }
  0x59   : > { %2364 = shalt.err (!%p2361_p2)
}
  0x5a   : > { %2183 = dma.hbm_to_vmem [thread:$0]  (!%p2611_p11), %s2988_s5, 512, %s267_s20, [#allocation11], %s2490_s22, %s2490_s22, %s2491_s23  }
  0x5b   : > { %s44_s14 = sadd.s32 1, %s2473_s26  ;;  %s37_s16 = sadd.s32 1, %s2481_s28 }
  0x5c   : > { %p51_p2 = scmp.ne.s32.totalorder %s2473_s26, %s2469_s25  ;;  %p39_p8 = scmp.ge.s32.totalorder %s37_s16, 2 }
  0x5d   : > { %p52_p13 = scmp.eq.s32.totalorder %s2485_s29, 0  ;;  %p3009_p6 = scmp.ne.s32.totalorder %s3002_s10, 0 }
  0x5e   : > { %p2195_p3 = scmp.lt.s32.totalorder %s2485_s29, 2  ;;  %s3027_s16 = smov (%p39_p8, %s37_s16), 0 }
  0x5f   : > { %p2706_p10 = por %p3009_p6, %p51_p2  ;;  %p53_p5 = por %p52_p13, %p51_p2 }
  0x60   : > { %s283_s24 = sand.u32 1, %s2473_s26   ;;  %s41_s12 = ssub.s32 %s2481_s28, %s3027_s16 }
  0x61   : > { %p42_p7 = scmp.eq.s32.totalorder %s41_s12, 0  ;;  %s1998_s20 = sshll.u32 %s283_s24, 3 }
  0x62   : > { %s1999_s22 = sshll.u32 %s2481_s28, 7  ;;  %s287_s17 = scalar_lea.vmem [#allocation4], %s1998_s20 }
  0x63   : > { %s2718_s23 = scalar_select %p42_p7, %s2473_s26, %s44_s14  }
  0x64   : > { %s2723_s10 = scalar_lea.hbm %s2983_s0, %s1999_s22  ;;  %s294_s19 = sshll.u32 %s287_s17, 4  ;;  %s2725_s19 = int_to_ptr.vmem [resolvable:$true] %s294_s19 }
  0x65   : > { %p2729_p11 = pnand %p2195_p3, %p53_p5  ;;  %s284_s15 = scalar_lea.sflag [#allocation5], %s283_s24 }
  0x66   : > { %s2365_s18 = scalar_lea.hbm %s2723_s10, 128  ;;  %s2370_s12 = scalar_lea.hbm %s2983_s0, 256 }
  0x67   : > { %p2366_p9 = scmp.ne.s32.totalorder %s2723_s10, %s2365_s18  ;;  %p2367_p12 = pneg %p2729_p11 }
  0x68   : > { %p2371_p4 = scmp.lt.u32.totalorder %s2723_s10, %s2983_s0  ;;  %p2372_p2 = scmp.lt.u32.totalorder %s2370_s12, %s2365_s18 }
  0x69   : > { %p2368_p0 = pnand %p2367_p12, %p2366_p9  ;;  %p2374_p13 = scmp.lt.u32.totalorder %s2365_s18, %s2723_s10 }
  0x6a   : > { %p2373_p8 = por %p2372_p2, %p2371_p4 }
  0x6b   : > { %p2369_p1 = pneg %p2368_p0 }
  0x6c   : > { %p2375_p6 = por %p2374_p13, %p2373_p8 }
  0x6e   : > { %p2376_p3 = pnand %p2375_p6, %p2369_p1 }
  0x70   : > { %2379 = shalt.err (!%p2376_p3)
}
  0x71   : > { %s2380_s24 = scalar_lea.vmem %s2725_s19, 128  ;;  %s2492_s30 = smov [#allocation4]  }
  0x72   : > { %p2381_p5 = scmp.ne.s32.totalorder %s2725_s19, %s2380_s24  ;;  %s2385_s8 = sshll.u32 %s2492_s30, 4  ;;  %s2386_s8 = int_to_ptr.vmem [resolvable:$false] %s2385_s8 }
  0x73   : > { %s2387_s17 = scalar_lea.vmem %s2386_s8, 256  ;;  %p2388_p0 = scmp.lt.s32.totalorder %s2725_s19, %s2386_s8 }
  0x74   : > { %p2383_p7 = pnand %p2381_p5, %p2367_p12  ;;  %p2389_p4 = scmp.lt.s32.totalorder %s2387_s17, %s2380_s24 }
  0x76   : > { %p2384_p9 = pneg %p2383_p7  ;;  %p2390_p2 = por %p2389_p4, %p2388_p0 }
  0x78   : > { %p2391_p8 = pnand %p2390_p2, %p2384_p9 }
  0x7a   : > { %2394 = shalt.err (!%p2391_p8)
}
  0x7b   : > { %2187 = dma.hbm_to_vmem [thread:$0]  (!%p2729_p11), %s2723_s10, 128, %s2725_s19, %s284_s15  }
  0x7c   : > { %p3012_p1 = scmp.ne.s32.totalorder %s3006_s13, 0 }
  0x7d   : > { %s2761_s18 = sand.u32 (!%p3012_p1), 1, %s2469_s25   ;;  %p3013_p12 = scmp.ne.s32.totalorder (!%p3012_p1), %s3003_s11, 0 }
  0x7e   : > { %303 = sbr.rel (%p3012_p1) target bundleno = 1470 (0x5be), region = 48  ;;  %s2001_s6 = sshll.u32 (!%p3012_p1), %s2761_s18, 3 }
  0x7f   : > { %s306_s14 = scalar_lea.sflag (!%p3012_p1), [#allocation5], %s2761_s18  ;;  %s2767_s12 = scalar_lea.vmem (!%p3012_p1), [#allocation4], %s2001_s6 }
  0x85   : > { %2448 = dma.done.wait (%p3013_p12), %s306_s14, 128  }
  0x86   : > { %2450 = vsyncadd (%p3013_p12), %s306_s14, 4294967168  ;;  %p3014_p11 = scmp.ne.s32.totalorder %s3001_s9, 0 }
  0x88   : > { %2452 = dma.done.wait (%p3014_p11), [#allocation8], 1024  }
  0x89   : > { %2454 = vsyncadd (%p3014_p11), [#allocation8], 4294966272 }
  0x8a   : > { %2456 = dma.done.wait (%p3014_p11), [#allocation11], 512  }
  0x8b   : > { %2458 = vsyncadd (%p3014_p11), [#allocation11], 4294966784  ;;  %v2493_v0 = vmov 0.0|0.0   ;;  %vm2494_vm0 = vmmov 0   ;;  %v2495_v1 = vmov 0.0   ;;  %v357_v2 = vld [vmem:[#allocation9] sm:$0xff]  ;;  %v457_v25 = vlaneseq }
  0x8c   : > { %2140 = vmatprep.subr.bf16.mxu0 %v2493_v0  ;;  %2146 = vmatprep.subr.bf16.mxu1 %v2493_v0  ;;  %v358_v3 = vld [vmem:[#allocation9 + $0x8] sm:$0xff]  ;;  %v359_v4 = vld [vmem:[#allocation9 + $0x10] sm:$0xff]  ;;  %v360_v6 = vld [vmem:[#allocation9 + $0x18] sm:$0xff]  ;;  %vm368_vm1 = vcmask 261120   ;;  %s2496_s19 = smov 104   ;;  %s2497_s21 = smov 120  }
  0x8d   : > { %2075 = vmatprep.mubr.msk.f32.mxu0 %vm2494_vm0, %v2495_v1  ;;  %2086 = vmatprep.mubr.msk.f32.mxu1 %vm2494_vm0, %v2495_v1  ;;  %v2141_v5 = vpack.c.bf16 %v358_v3, %v357_v2  ;;  %v748_v7 = vld [vmem:[#allocation7] sm:$0xff]  ;;  %v749_v8 = vld [vmem:[#allocation7 + $0x8] sm:$0xff]  ;;  %v750_v10 = vld [vmem:[#allocation7 + $0x10] sm:$0xff]  ;;  %v2144_v12 = vpack.c.bf16 %v360_v6, %v359_v4  ;;  %s2498_s15 = smov 112   ;;  %s2499_s20 = smov 96   ;;  %v458_v29 = vshrl.u32 %v457_v25, 7 }
  0x8e   : > { %v2147_v9 = vpack.c.bf16 %v749_v8, %v748_v7  ;;  %v751_v11 = vld [vmem:[#allocation7 + $0x18] sm:$0xff]  ;;  %v2006_v15 = vld [vmem:[%s2987_s4] ss:$0 sm:$0xff]  ;;  %v2500_v23 = vmov 1983009808   ;;  %vm588_vm2 = vcmask 64512  }
  0x8f   : > { %2142 = vmatpush3.bf16.msra.mxu0 %v2141_v5  ;;  %v2150_v13 = vpack.c.bf16 %v751_v11, %v750_v10  ;;  %v356_v14 = vld [vmem:[%s2767_s12] sm:$0xff]  ;;  %v455_v24 = vunpack.c.l.s4 %v2500_v23  ;;  %v2501_v26 = vmov 1934713408   ;;  %s2502_s22 = smov 16   ;;  %s2503_s24 = smov 8   ;;  %vm1777_vm3 = vcmask 130048  }
  0x90   : > { %2143 = vmatprep.subr.bf16.mxu0 %v2493_v0  ;;  %2148 = vmatpush3.bf16.msra.mxu1 %v2147_v9  ;;  %v2012_v17 = vld [vmem:[%s2985_s2] ss:$0 sm:$0xff]  ;;  %v487_v27 = vunpack.c.l.s4 %v2501_v26  ;;  %s2504_s30 = smov 24   ;;  %vm1779_vm4 = vcmask 195584   ;;  %s3015_s14 = sld [smem:[#allocation19_spill]] }
  0x91   : > { %2149 = vmatprep.subr.bf16.mxu1 %v2493_v0  ;;  %v456_v28 = vunpack.c.0.s8 %v455_v24  ;;  %s2033_s12 = sshll.u32 %s2477_s27, 7  ;;  %s351_s9 = scalar_lea.vmem [#allocation12], %s2001_s6 }
  0x92   : > { %v488_v32 = vunpack.c.0.s8 %v487_v27  ;;  %s1881_s11 = sshll.u32 %s351_s9, 4  ;;  %s2505_s6 = smov [#allocation12]   ;;  %s2935_s11 = int_to_ptr.vmem [resolvable:$true] %s1881_s11 }
  0x93   : > { %2145 = vmatpush3.bf16.msra.mxu0 %v2144_v12  ;;  %v2804_v33 = vsub.s32 %v456_v28, %v458_v29  ;;  %s2395_s27 = scalar_lea.vmem %s2935_s11, 128 }
  0x94   : > { %2151 = vmatpush3.bf16.msra.mxu1 %v2150_v13  ;;  %2099 = vmatprep.subr.mxu0 %v2495_v1  ;;  %v2806_v40 = vsub.s32 %v488_v32, %v458_v29  ;;  %p2396_p13 = scmp.ne.s32.totalorder %s2935_s11, %s2395_s27 }
  0x95   : > { %2089 = vmatprep.subr.mxu1 %v2495_v1 }
  0x96   : > { %2076 = vmatmul.mubr.msk.f32.vlgmr.msra.gmra.mrb[0].mxu0 %vm368_vm1, %v356_v14  ;;  %p2397_p6 = pnand %p2396_p13, %p2706_p10 }
  0x97   : > { %2087 = vmatmul.mubr.msk.f32.vlgmr.msra.gmra.mrb[0].mxu1 %vm368_vm1, %v356_v14  ;;  %2101 = vmatprep.mubr.msk.f32.mxu0 %vm2494_vm0, %v2495_v1 }
  0x98   : > { %2091 = vmatprep.mubr.msk.f32.mxu1 %vm2494_vm0, %v2495_v1  ;;  %p2398_p3 = pneg %p2397_p6 }
 0x169   : > { %v438_v16 = vpop.f32.mrb[0].mxu0 }
 0x16a   : > { %v439_v18 = vadd.f32 %v2006_v15, %v438_v16  ;;  %v2077_v19 = vpop.f32.mrb[1].mxu0  ;;  %v829_v20 = vpop.f32.mrb[0].mxu1 }
 0x16b   : > { %v2088_v21 = vpop.f32.mrb[1].mxu1  ;;  %v830_v22 = vadd.f32 %v2012_v17, %v829_v20 }
 0x16c   : > { %449 = vrot.lane.b32.xlu1 %v439_v18, %s2496_s19  ;;  %443 = vrot.lane.b32.xlu0 %v439_v18, %s2497_s21 }
 0x170   : > { %834 = vrot.lane.b32.xlu1 %v830_v22, %s2497_s21  ;;  %446 = vrot.lane.b32.xlu0 %v439_v18, %s2498_s15 }
 0x174   : > { %840 = vrot.lane.b32.xlu1 %v830_v22, %s2496_s19  ;;  %837 = vrot.lane.b32.xlu0 %v830_v22, %s2498_s15  ;;  %s3016_s19 = sld [smem:[#allocation20_spill]]  ;;  %s1867_s15 = scalar_lea.sflag [#allocation6], %s2761_s18 }
 0x178   : > { %593 = vrot.lane.b32.xlu0 %v439_v18, %s2499_s20 }
 0x17a   : > { %s2933_s21 = scalar_lea.hbm %s3016_s19, %s2033_s12 }
 0x1de   : > { %v450_v30 = vpop.permute.xlu1 %449  ;;  %v444_v31 = vpop.permute.xlu0 %443 }
 0x1df   : > { %595 = vrot.lane.b32.xlu1 %v444_v31, %s2499_s20  ;;  %v468_v34 = vcombine.low %v444_v31, %v450_v30  ;;  %v469_v35 = vcombine.high %v444_v31, %v450_v30 }
 0x1e1   : > { %v476_v41 = vrot.slane %v468_v34, %v2804_v33  ;;  %v483_v42 = vrot.slane %v469_v35, %v2804_v33 }
 0x1e2   : > { %v835_v36 = vpop.permute.xlu1 %834  ;;  %v447_v37 = vpop.permute.xlu0 %446 }
 0x1e3   : > { %v452_v38 = vcombine.low %v439_v18, %v447_v37  ;;  %v453_v39 = vcombine.high %v439_v18, %v447_v37  ;;  %599 = vrot.lane.b32.xlu1 %v450_v30, %s2499_s20  ;;  %597 = vrot.lane.b32.xlu0 %v447_v37, %s2499_s20  ;;  %s2399_s20 = sshll.u32 %s2505_s6, 4  ;;  %s2400_s20 = int_to_ptr.vmem [resolvable:$false] %s2399_s20 }
 0x1e4   : > { %p2402_p5 = scmp.lt.s32.totalorder %s2935_s11, %s2400_s20 }
 0x1e5   : > { %v460_v43 = vrot.slane %v452_v38, %v2804_v33  ;;  %v467_v44 = vrot.slane %v453_v39, %v2804_v33 }
 0x1e6   : > { %v841_v45 = vpop.permute.xlu1 %840  ;;  %v838_v46 = vpop.permute.xlu0 %837 }
 0x1e7   : > { %v484_v47 = vcombine.low %v460_v43, %v476_v41  ;;  %v485_v48 = vcombine.high %v460_v43, %v476_v41  ;;  %v500_v49 = vcombine.low %v467_v44, %v483_v42  ;;  %v501_v50 = vcombine.high %v467_v44, %v483_v42 }
 0x1e8   : > { %v859_v51 = vcombine.low %v835_v36, %v841_v45  ;;  %v860_v52 = vcombine.high %v835_v36, %v841_v45  ;;  %v843_v53 = vcombine.low %v830_v22, %v838_v46  ;;  %v844_v54 = vcombine.high %v830_v22, %v838_v46 }
 0x1e9   : > { %v492_v55 = vrot.slane %v484_v47, %v2806_v40  ;;  %v499_v56 = vrot.slane %v485_v48, %v2806_v40  ;;  %v508_v57 = vrot.slane %v500_v49, %v2806_v40  ;;  %v515_v58 = vrot.slane %v501_v50, %v2806_v40 }
 0x1ea   : > { %v867_v59 = vrot.slane %v859_v51, %v2804_v33  ;;  %v874_v60 = vrot.slane %v860_v52, %v2804_v33  ;;  %v851_v61 = vrot.slane %v843_v53, %v2804_v33  ;;  %v858_v62 = vrot.slane %v844_v54, %v2804_v33 }
 0x1eb   : > { %v520_v63 = vcombine.low %v492_v55, %v499_v56  ;;  %v2008_v2 = vcombine.high %v492_v55, %v499_v56  ;;  %v536_v3 = vcombine.low %v508_v57, %v515_v58  ;;  %v2009_v4 = vcombine.high %v508_v57, %v515_v58  ;;  %v594_v55 = vpop.permute.xlu0 %593 }
 0x1ec   : > { %v875_v5 = vcombine.low %v851_v61, %v867_v59  ;;  %v876_v6 = vcombine.high %v851_v61, %v867_v59  ;;  %v891_v7 = vcombine.low %v858_v62, %v874_v60  ;;  %v892_v8 = vcombine.high %v858_v62, %v874_v60 }
 0x1ed   : > { %v527_v9 = vrot.slane %v520_v63, %v2804_v33  ;;  %v535_v10 = vrot.slane %v2008_v2, %v2804_v33  ;;  %v543_v11 = vrot.slane %v536_v3, %v2804_v33  ;;  %v551_v12 = vrot.slane %v2009_v4, %v2804_v33 }
 0x1ee   : > { %v883_v13 = vrot.slane %v875_v5, %v2806_v40  ;;  %v890_v14 = vrot.slane %v876_v6, %v2806_v40  ;;  %v899_v15 = vrot.slane %v891_v7, %v2806_v40  ;;  %v906_v16 = vrot.slane %v892_v8, %v2806_v40 }
 0x1ef   : > { %v552_v17 = vcombine.low %v527_v9, %v535_v10  ;;  %v553_v18 = vcombine.high %v527_v9, %v535_v10  ;;  %v568_v19 = vcombine.low %v543_v11, %v551_v12  ;;  %v569_v20 = vcombine.high %v543_v11, %v551_v12 }
 0x1f0   : > { %v911_v21 = vcombine.low %v883_v13, %v890_v14  ;;  %v2014_v22 = vcombine.high %v883_v13, %v890_v14  ;;  %v927_v23 = vcombine.low %v899_v15, %v906_v16  ;;  %v2015_v24 = vcombine.high %v899_v15, %v906_v16 }
 0x1f1   : > { %v560_v25 = vrot.slane %v552_v17, %v2806_v40  ;;  %v567_v26 = vrot.slane %v553_v18, %v2806_v40  ;;  %v576_v27 = vrot.slane %v568_v19, %v2806_v40  ;;  %v583_v28 = vrot.slane %v569_v20, %v2806_v40 }
 0x1f2   : > { %v918_v29 = vrot.slane %v911_v21, %v2804_v33  ;;  %v926_v30 = vrot.slane %v2014_v22, %v2804_v33  ;;  %v934_v31 = vrot.slane %v927_v23, %v2804_v33  ;;  %v942_v32 = vrot.slane %v2015_v24, %v2804_v33 }
 0x1f3   : > { %v584_v34 = vcombine.low %v560_v25, %v576_v27  ;;  %v585_v35 = vcombine.high %v560_v25, %v576_v27  ;;  %v586_v36 = vcombine.low %v567_v26, %v583_v28  ;;  %v587_v37 = vcombine.high %v567_v26, %v583_v28 }
 0x1f4   : > { %v943_v38 = vcombine.low %v918_v29, %v926_v30  ;;  %v944_v39 = vcombine.high %v918_v29, %v926_v30  ;;  %v959_v41 = vcombine.low %v934_v31, %v942_v32  ;;  %v960_v42 = vcombine.high %v934_v31, %v942_v32 }
 0x1f5   : > { %589 = vst.msk [vmem:[#allocation2] sm:$0xff] %vm588_vm2, %v584_v34  ;;  %590 = vst.msk [vmem:[#allocation2 + $0x8] sm:$0xff] %vm588_vm2, %v585_v35 }
 0x1f6   : > { %591 = vst.msk [vmem:[#allocation2 + $0x10] sm:$0xff] %vm588_vm2, %v586_v36  ;;  %592 = vst.msk [vmem:[#allocation2 + $0x18] sm:$0xff] %vm588_vm2, %v587_v37  ;;  %v951_v43 = vrot.slane %v943_v38, %v2806_v40  ;;  %v967_v44 = vrot.slane %v959_v41, %v2806_v40  ;;  %v958_v45 = vrot.slane %v944_v39, %v2806_v40 }
 0x1f7   : > { %v974_v46 = vrot.slane %v960_v42, %v2806_v40 }
 0x1f8   : > { %v975_v49 = vcombine.low %v951_v43, %v967_v44  ;;  %v976_v52 = vcombine.high %v951_v43, %v967_v44 }
 0x1f9   : > { %v977_v50 = vcombine.low %v958_v45, %v974_v46  ;;  %v978_v54 = vcombine.high %v958_v45, %v974_v46 }
 0x1fc   : > { %v979_v47 = vld [vmem:[#allocation2] sm:$0xff]  ;;  %v980_v51 = vld [vmem:[#allocation2 + $0x8] sm:$0xff] }
 0x1fd   : > { %v981_v48 = vld [vmem:[#allocation2 + $0x10] sm:$0xff]  ;;  %2090 = vmatpush3.xpose.msk.msra.mxu1 %vm588_vm2, %v979_v47  ;;  %v982_v53 = vld [vmem:[#allocation2 + $0x18] sm:$0xff] }
 0x1fe   : > { %2100 = vmatpush3.xpose.msk.msra.mxu0 %vm588_vm2, %v981_v48  ;;  %2094 = vmatprep.subr.mxu1 %v2495_v1 }
 0x1ff   : > { %2109 = vmatprep.subr.mxu0 %v2495_v1 }
 0x200   : > { %2092 = vmatmul.mubr.msk.f32.vlgmr.msra.gmra.mrb[2].mxu1 %vm588_vm2, %v975_v49 }
 0x201   : > { %2102 = vmatmul.mubr.msk.f32.vlgmr.msra.gmra.mrb[2].mxu0 %vm588_vm2, %v977_v50  ;;  %2095 = vmatpush3.xpose.msk.msra.mxu1 %vm588_vm2, %v980_v51 }
 0x202   : > { %2096 = vmatprep.mubr.msk.f32.mxu1 %vm2494_vm0, %v2495_v1  ;;  %2104 = vmatprep.subr.mxu1 %v2495_v1 }
 0x203   : > { %2111 = vmatprep.mubr.msk.f32.mxu0 %vm2494_vm0, %v2495_v1 }
 0x204   : > { %2097 = vmatmul.mubr.msk.f32.vlgmr.msra.gmra.mrb[4].mxu1 %vm588_vm2, %v976_v52 }
 0x205   : > { %2105 = vmatpush3.xpose.msk.msra.mxu1 %vm588_vm2, %v982_v53  ;;  %2106 = vmatprep.mubr.msk.f32.mxu1 %vm2494_vm0, %v2495_v1 }
 0x206   : > { %2114 = vmatprep.subr.mxu1 %v2495_v1 }
 0x208   : > { %2107 = vmatmul.mubr.msk.f32.vlgmr.msra.gmra.mrb[6].mxu1 %vm588_vm2, %v978_v54 }
 0x209   : > { %2116 = vmatprep.mubr.msk.f32.mxu1 %vm2494_vm0, %v2495_v1 }
 0x251   : > { %v596_v56 = vpop.permute.xlu1 %595 }
 0x255   : > { %v600_v57 = vpop.permute.xlu1 %599  ;;  %v598_v58 = vpop.permute.xlu0 %597 }
 0x256   : > { %v621_v59 = vcombine.low %v596_v56, %v600_v57  ;;  %v622_v60 = vcombine.high %v596_v56, %v600_v57  ;;  %v605_v61 = vcombine.low %v594_v55, %v598_v58  ;;  %v606_v62 = vcombine.high %v594_v55, %v598_v58 }
 0x258   : > { %v629_v63 = vrot.slane %v621_v59, %v2804_v33  ;;  %v636_v2 = vrot.slane %v622_v60, %v2804_v33  ;;  %v613_v3 = vrot.slane %v605_v61, %v2804_v33  ;;  %v620_v4 = vrot.slane %v606_v62, %v2804_v33 }
 0x25a   : > { %v637_v5 = vcombine.low %v613_v3, %v629_v63  ;;  %v638_v6 = vcombine.high %v613_v3, %v629_v63  ;;  %v653_v7 = vcombine.low %v620_v4, %v636_v2  ;;  %v654_v8 = vcombine.high %v620_v4, %v636_v2 }
 0x25c   : > { %v645_v9 = vrot.slane %v637_v5, %v2806_v40  ;;  %v652_v10 = vrot.slane %v638_v6, %v2806_v40  ;;  %v661_v11 = vrot.slane %v653_v7, %v2806_v40  ;;  %v668_v12 = vrot.slane %v654_v8, %v2806_v40 }
 0x25e   : > { %v673_v13 = vcombine.low %v645_v9, %v652_v10  ;;  %v2010_v14 = vcombine.high %v645_v9, %v652_v10  ;;  %v689_v15 = vcombine.low %v661_v11, %v668_v12  ;;  %v2011_v16 = vcombine.high %v661_v11, %v668_v12  ;;  %v1781_v9 = vld [vmem:[#allocation10] sm:$0xff]  ;;  %v1782_v10 = vld [vmem:[#allocation10 + $0x8] sm:$0xff] }
 0x25f   : > { %v2153_v11 = vpack.c.bf16 %v1782_v10, %v1781_v9 }
 0x260   : > { %v680_v17 = vrot.slane %v673_v13, %v2804_v33  ;;  %v688_v18 = vrot.slane %v2010_v14, %v2804_v33  ;;  %v696_v19 = vrot.slane %v689_v15, %v2804_v33  ;;  %v704_v20 = vrot.slane %v2011_v16, %v2804_v33 }
 0x262   : > { %v705_v21 = vcombine.low %v680_v17, %v688_v18  ;;  %v706_v22 = vcombine.high %v680_v17, %v688_v18  ;;  %v721_v23 = vcombine.low %v696_v19, %v704_v20  ;;  %v722_v24 = vcombine.high %v696_v19, %v704_v20 }
 0x264   : > { %v713_v25 = vrot.slane %v705_v21, %v2806_v40  ;;  %v720_v26 = vrot.slane %v706_v22, %v2806_v40  ;;  %v729_v27 = vrot.slane %v721_v23, %v2806_v40  ;;  %v736_v28 = vrot.slane %v722_v24, %v2806_v40 }
 0x266   : > { %v737_v29 = vcombine.low %v713_v25, %v729_v27  ;;  %v738_v30 = vcombine.high %v713_v25, %v729_v27  ;;  %v739_v31 = vcombine.low %v720_v26, %v736_v28  ;;  %v740_v32 = vcombine.high %v720_v26, %v736_v28 }
 0x268   : > { %741 = vst.msk [vmem:[#allocation3] sm:$0xff] %vm588_vm2, %v737_v29  ;;  %742 = vst.msk [vmem:[#allocation3 + $0x8] sm:$0xff] %vm588_vm2, %v738_v30 }
 0x269   : > { %743 = vst.msk [vmem:[#allocation3 + $0x10] sm:$0xff] %vm588_vm2, %v739_v31  ;;  %744 = vst.msk [vmem:[#allocation3 + $0x18] sm:$0xff] %vm588_vm2, %v740_v32 }
 0x26f   : > { %v1324_v34 = vld [vmem:[#allocation3] sm:$0xff]  ;;  %v1325_v35 = vld [vmem:[#allocation3 + $0x8] sm:$0xff] }
 0x270   : > { %2110 = vmatpush3.msra.mxu0 %v1324_v34  ;;  %2115 = vmatpush3.msra.mxu1 %v1325_v35  ;;  %v1326_v62 = vld [vmem:[#allocation3 + $0x10] sm:$0xff]  ;;  %v1327_v4 = vld [vmem:[#allocation3 + $0x18] sm:$0xff] }
 0x271   : > { %2119 = vmatprep.subr.mxu0 %v2495_v1  ;;  %2124 = vmatprep.subr.mxu1 %v2495_v1 }
 0x2d3   : > { %v1056_v36 = vpop.f32.mrb[2].mxu1 }
 0x2d4   : > { %v1208_v37 = vpop.f32.mrb[2].mxu0  ;;  %v2093_v38 = vpop.f32.mrb[3].mxu1  ;;  %v1288_v41 = vsel %vm588_vm2, %v1056_v36, -inf }
 0x2d5   : > { %v2103_v39 = vpop.f32.mrb[3].mxu0  ;;  %1289 = vmax.xlane.f32.xlu0 %v1288_v41  ;;  %v1294_v45 = vsel %vm588_vm2, %v1208_v37, -inf }
 0x2d7   : > { %v1132_v42 = vpop.f32.mrb[4].mxu1 }
 0x2d8   : > { %v2098_v43 = vpop.f32.mrb[5].mxu1  ;;  %v1291_v44 = vsel %vm588_vm2, %v1132_v42, -inf }
 0x2d9   : > { %1292 = vmax.xlane.f32.xlu1 %v1291_v44  ;;  %1295 = vmax.xlane.f32.xlu0 %v1294_v45  ;;  %v1783_v44 = vld [vmem:[#allocation10 + $0x10] sm:$0xff]  ;;  %v1784_v45 = vld [vmem:[#allocation10 + $0x18] sm:$0xff] }
 0x2db   : > { %v1284_v46 = vpop.f32.mrb[6].mxu1 }
 0x2dc   : > { %v2108_v47 = vpop.f32.mrb[7].mxu1  ;;  %v1297_v48 = vsel %vm588_vm2, %v1284_v46, -inf }
 0x2dd   : > { %1298 = vmax.xlane.f32.xlu1 %v1297_v48 }
 0x362   : > { %v1290_v49 = vpop.xlane.xlu0 %1289 }
 0x363   : > { %v1300_v50 = vsub.f32 %v1056_v36, %v1290_v49 }
 0x365   : > { %v1304_v51 = vmul.f32 1.442695, %v1300_v50  ;;  %v2156_v50 = vpack.c.bf16 %v1784_v45, %v1783_v44 }
 0x366   : > { %v1293_v52 = vpop.xlane.xlu1 %1292  ;;  %v1296_v53 = vpop.xlane.xlu0 %1295 }
 0x367   : > { %2265 = vpow2.f32 %v1304_v51  ;;  %v1301_v54 = vsub.f32 %v1132_v42, %v1293_v52  ;;  %v1302_v55 = vsub.f32 %v1208_v37, %v1296_v53 }
 0x369   : > { %v1306_v56 = vmul.f32 1.442695, %v1301_v54  ;;  %v1308_v57 = vmul.f32 1.442695, %v1302_v55 }
 0x36a   : > { %v1299_v58 = vpop.xlane.xlu1 %1298 }
 0x36b   : > { %2267 = vpow2.f32 %v1306_v56  ;;  %v1303_v59 = vsub.f32 %v1284_v46, %v1299_v58 }
 0x36c   : > { %2269 = vpow2.f32 %v1308_v57 }
 0x36d   : > { %v1310_v60 = vmul.f32 1.442695, %v1303_v59 }
 0x36f   : > { %2271 = vpow2.f32 %v1310_v60 }
 0x371   : > { %v2266_v61 = vpop.eup %2265 }
 0x372   : > { %2112 = vmatmul.mubr.msk.f32.vlgmr.msra.gmra.mrb[4].mxu0 %vm588_vm2, %v2266_v61  ;;  %v1312_v63 = vsel %vm588_vm2, %v2266_v61, 0.0 }
 0x373   : > { %2120 = vmatpush3.msra.mxu0 %v1326_v62  ;;  %1313 = vadd.xlane.f32.xlu0 %v1312_v63 }
 0x374   : > { %2121 = vmatprep.mubr.msk.f32.mxu0 %vm2494_vm0, %v2495_v1  ;;  %2152 = vmatprep.subr.bf16.mxu0 %v2493_v0 }
 0x375   : > { %v2268_v2 = vpop.eup %2267 }
 0x376   : > { %v2270_v3 = vpop.eup %2269  ;;  %2117 = vmatmul.mubr.msk.f32.vlgmr.msra.gmra.mrb[8].mxu1 %vm588_vm2, %v2268_v2  ;;  %v1315_v5 = vsel %vm588_vm2, %v2268_v2, 0.0 }
 0x377   : > { %2122 = vmatmul.mubr.msk.f32.vlgmr.msra.gmra.mrb[6].mxu0 %vm588_vm2, %v2270_v3  ;;  %2125 = vmatpush3.msra.mxu1 %v1327_v4  ;;  %v1318_v6 = vsel %vm588_vm2, %v2270_v3, 0.0 }
 0x378   : > { %1316 = vadd.xlane.f32.xlu0 %v1315_v5  ;;  %1319 = vadd.xlane.f32.xlu1 %v1318_v6 }
 0x379   : > { %v2272_v7 = vpop.eup %2271  ;;  %2126 = vmatprep.mubr.msk.f32.mxu1 %vm2494_vm0, %v2495_v1  ;;  %2137 = vmatprep.mubr.msk.f32.mxu0 %vm2494_vm0, %v2495_v1 }
 0x37a   : > { %2127 = vmatmul.mubr.msk.f32.vlgmr.msra.gmra.mrb[10].mxu1 %vm588_vm2, %v2272_v7  ;;  %v1321_v8 = vsel %vm588_vm2, %v2272_v7, 0.0  ;;  %2154 = vmatpush3.bf16.msra.mxu0 %v2153_v11 }
 0x37b   : > { %2155 = vmatprep.subr.bf16.mxu0 %v2493_v0 }
 0x37c   : > { %1322 = vadd.xlane.f32.xlu0 %v1321_v8 }
 0x37e   : > { %2157 = vmatpush3.bf16.msra.mxu0 %v2156_v50 }
 0x400   : > { %v1314_v12 = vpop.xlane.xlu0 %1313 }
 0x401   : > { %2273 = vrcp.f32 %v1314_v12 }
 0x405   : > { %v1317_v13 = vpop.xlane.xlu0 %1316  ;;  %v1320_v14 = vpop.xlane.xlu1 %1319 }
 0x406   : > { %2275 = vrcp.f32 %v1320_v14 }
 0x407   : > { %2277 = vrcp.f32 %v1317_v13  ;;  %v2030_v13 = vld [vmem:[%s3015_s14] ss:$0 sm:$0xff] }
 0x409   : > { %v1323_v15 = vpop.xlane.xlu0 %1322 }
 0x40a   : > { %2279 = vrcp.f32 %v1323_v15 }
 0x40b   : > { %v2274_v17 = vpop.eup %2273 }
 0x410   : > { %v2276_v19 = vpop.eup %2275 }
 0x411   : > { %v2278_v25 = vpop.eup %2277 }
 0x414   : > { %v2280_v0 = vpop.eup %2279 }
 0x445   : > { %v1397_v1 = vpop.f32.mrb[4].mxu0 }
 0x446   : > { %v2113_v16 = vpop.f32.mrb[5].mxu0  ;;  %v1624_v22 = vmul.f32 %v2274_v17, %v1397_v1 }
 0x449   : > { %v1470_v18 = vpop.f32.mrb[8].mxu1 }
 0x44a   : > { %v1543_v20 = vpop.f32.mrb[6].mxu0  ;;  %v2118_v21 = vpop.f32.mrb[9].mxu1  ;;  %v1625_v29 = vmul.f32 %v2278_v25, %v1470_v18 }
 0x44b   : > { %v1626_v23 = vmul.f32 %v2276_v19, %v1543_v20  ;;  %v2123_v24 = vpop.f32.mrb[7].mxu0 }
 0x44d   : > { %v1628_v26 = vcombine.low %v1624_v22, %v1626_v23  ;;  %v1629_v27 = vcombine.high %v1624_v22, %v1626_v23  ;;  %v1616_v28 = vpop.f32.mrb[10].mxu1 }
 0x44e   : > { %v1627_v30 = vmul.f32 %v2280_v0, %v1616_v28  ;;  %v2128_v31 = vpop.f32.mrb[11].mxu1 }
 0x44f   : > { %v1636_v35 = vrot.slane %v1628_v26, %v2804_v33  ;;  %v1643_v36 = vrot.slane %v1629_v27, %v2804_v33 }
 0x450   : > { %v1644_v32 = vcombine.low %v1625_v29, %v1627_v30  ;;  %v1645_v34 = vcombine.high %v1625_v29, %v1627_v30 }
 0x452   : > { %v1652_v37 = vrot.slane %v1644_v32, %v2804_v33  ;;  %v1659_v38 = vrot.slane %v1645_v34, %v2804_v33 }
 0x454   : > { %v1660_v39 = vcombine.low %v1636_v35, %v1652_v37  ;;  %v1661_v41 = vcombine.high %v1636_v35, %v1652_v37  ;;  %v1676_v42 = vcombine.low %v1643_v36, %v1659_v38  ;;  %v1677_v43 = vcombine.high %v1643_v36, %v1659_v38 }
 0x456   : > { %v1668_v46 = vrot.slane %v1660_v39, %v2806_v40  ;;  %v1675_v47 = vrot.slane %v1661_v41, %v2806_v40  ;;  %v1684_v48 = vrot.slane %v1676_v42, %v2806_v40  ;;  %v1691_v49 = vrot.slane %v1677_v43, %v2806_v40 }
 0x458   : > { %v1696_v51 = vcombine.low %v1668_v46, %v1675_v47  ;;  %v2028_v52 = vcombine.high %v1668_v46, %v1675_v47  ;;  %v1712_v53 = vcombine.low %v1684_v48, %v1691_v49  ;;  %v2029_v54 = vcombine.high %v1684_v48, %v1691_v49 }
 0x45a   : > { %v1703_v55 = vrot.slane %v1696_v51, %v2804_v33  ;;  %v1711_v56 = vrot.slane %v2028_v52, %v2804_v33  ;;  %v1719_v57 = vrot.slane %v1712_v53, %v2804_v33  ;;  %v1727_v58 = vrot.slane %v2029_v54, %v2804_v33 }
 0x45c   : > { %v1729_v59 = vcombine.high %v1703_v55, %v1711_v56  ;;  %v1745_v60 = vcombine.high %v1719_v57, %v1727_v58  ;;  %v1728_v61 = vcombine.low %v1703_v55, %v1711_v56  ;;  %v1744_v62 = vcombine.low %v1719_v57, %v1727_v58 }
 0x45e   : > { %v1743_v63 = vrot.slane %v1729_v59, %v2806_v40  ;;  %v1759_v2 = vrot.slane %v1745_v60, %v2806_v40  ;;  %v1736_v3 = vrot.slane %v1728_v61, %v2806_v40  ;;  %v1752_v4 = vrot.slane %v1744_v62, %v2806_v40 }
 0x460   : > { %v1762_v5 = vcombine.low %v1743_v63, %v1759_v2  ;;  %v1761_v6 = vcombine.high %v1736_v3, %v1752_v4  ;;  %v1763_v7 = vcombine.high %v1743_v63, %v1759_v2  ;;  %v1760_v8 = vcombine.low %v1736_v3, %v1752_v4 }
 0x462   : > { %1769 = vrot.lane.b32.xlu0 %v1762_v5, %s2502_s22  ;;  %1765 = vrot.lane.b32.xlu1 %v1761_v6, %s2503_s24  ;;  %s2401_s22 = scalar_lea.vmem %s2400_s20, 256 }
 0x463   : > { %p2403_p7 = scmp.lt.s32.totalorder %s2401_s22, %s2395_s27 }
 0x465   : > { %p2404_p9 = por %p2403_p7, %p2402_p5 }
 0x466   : > { %1773 = vrot.lane.b32.xlu1 %v1763_v7, %s2504_s30 }
 0x467   : > { %p2405_p0 = pnand %p2404_p9, %p2398_p3 }
 0x4d4   : > { %v1766_v33 = vpop.permute.xlu1 %1765  ;;  %v1770_v9 = vpop.permute.xlu0 %1769 }
 0x4d5   : > { %v1776_v10 = vsel %vm588_vm2, %v1760_v8, %v1766_v33 }
 0x4d6   : > { %v1778_v11 = vsel %vm1777_vm3, %v1776_v10, %v1770_v9 }
 0x4d8   : > { %v1774_v40 = vpop.permute.xlu1 %1773 }
 0x4d9   : > { %v1780_v12 = vsel %vm1779_vm4, %v1778_v11, %v1774_v40 }
 0x4da   : > { %2138 = vmatmul.mubr.msk.f32.vlgmr.msra.gmra.mrb[8].mxu0 %vm368_vm1, %v1780_v12 }
 0x5ad   : > { %v1861_v14 = vpop.f32.mrb[8].mxu0 }
 0x5ae   : > { %v1862_v15 = vadd.f32 %v2030_v13, %v1861_v14  ;;  %v2139_v1 = vpop.f32.mrb[9].mxu0 }
 0x5b0   : > { %1865 = vst.msk [vmem:[%s351_s9] sm:$0xff] %vm368_vm1, %v1862_v15 }
 0x5b1   : > { %2408 = shalt.err (!%p2405_p0)
}
 0x5b2   : > { %s2409_s18 = scalar_lea.hbm %s2933_s21, 128  ;;  %s2413_s8 = scalar_lea.hbm %s3016_s19, 256 }
 0x5b3   : > { %p2410_p4 = scmp.ne.s32.totalorder %s2933_s21, %s2409_s18  ;;  %p2414_p1 = scmp.lt.u32.totalorder %s2933_s21, %s3016_s19 }
 0x5b4   : > { %p2415_p12 = scmp.lt.u32.totalorder %s2413_s8, %s2409_s18  ;;  %p2417_p13 = scmp.lt.u32.totalorder %s2409_s18, %s2933_s21 }
 0x5b5   : > { %p2411_p2 = pnand %p2410_p4, %p2706_p10 }
 0x5b6   : > { %p2416_p11 = por %p2415_p12, %p2414_p1 }
 0x5b7   : > { %p2412_p8 = pneg %p2411_p2 }
 0x5b8   : > { %p2418_p6 = por %p2417_p13, %p2416_p11 }
 0x5ba   : > { %p2419_p3 = pnand %p2418_p6, %p2412_p8 }
 0x5bc   : > { %2422 = shalt.err (!%p2419_p3)
}
 0x5bd   : > { %2172 = dma.vmem_to_hbm [thread:$0]  (%p2706_p10), %s2935_s11, 128, %s2933_s21, %s1867_s15  }
 0x5be PF: > { %s3017_s12 = sld [smem:[#allocation17_spill]]  ;;  %s3018_s9 = sld [smem:[#allocation18_spill]] }
 0x5bf   : > { %p3020_p7 = scmp.ge.s32.totalorder %s2485_s29, 2 }
 0x5c4   : > { %s1893_s13 = sand.u32 1, %s3017_s12   ;;  %p3019_p5 = scmp.ne.s32.totalorder %s3018_s9, 0 }
 0x5c5   : > { %s1894_s10 = scalar_lea.sflag [#allocation6], %s1893_s13 }
 0x5c6   : > { %p2189_p9 = pnand %p3020_p7, %p3019_p5 }
 0x5c8   : > { %2460 = dma.done.wait (!%p2189_p9), %s1894_s10, 128  }
 0x5c9   : > { %2462 = vsyncadd (!%p2189_p9), %s1894_s10, 4294967168  ;;  %s25_s29 = sadd.s32 1, %s2485_s29   ;;  %s3021_s24 = smov %s2469_s25 }
 0x5ca   : > { %p22_p0 = scmp.ge.s32.totalorder %s25_s29, 4   ;;  %s3022_s25 = smov %s2473_s26 }
 0x5cb   : > { %s3023_s26 = smov %s2718_s23  ;;  %s3024_s27 = smov %s2481_s28 }
 0x5cc   : > { %s3025_s28 = smov %s3027_s16  ;;  %24 = sbr.rel (!%p22_p0) target bundleno = 11 (0xb), region = 110 }
 0x5d3   :  { %1899 = vsyncpa [#allocation5], 1 }
 0x5d4   :  { %1901 = vsyncpa [#allocation5 + $0x1], 1 }
 0x5d5   :  { %1902 = vsyncpa [#allocation8], 1 }
 0x5d6   :  { %1903 = vsyncpa [#allocation11], 1 }
 0x5d7   :  { %1904 = vsyncpa [#allocation6], 1 }
 0x5d8   :  { %1906 = vsyncpa [#allocation6 + $0x1], 1 }

// kernel: tpu_custom_call.1
= control target key start
LH: loop header
LB: loop body
LE: loop exit
PB: predicated region body
PF: predicated region fallthrough
CT: control target
= control target key end

     0   :  { %s2983_s0 = inlined_call_operand.hbm [shape: f32[2,8,32], index: 0, kind: input, shape index: {}]   ;;  %s2984_s1 = inlined_call_operand.hbm [shape: f32[32,32], index: 1, kind: input, shape index: {}]   ;;  %s2985_s2 = inlined_call_operand.vmem [shape: f32[1,32], index: 2, kind: input, shape index: {}]   ;;  %s2986_s3 = inlined_call_operand.hbm [shape: f32[32,64], index: 3, kind: input, shape index: {}]   ;;  %s2987_s4 = inlined_call_operand.vmem [shape: f32[1,64], index: 4, kind: input, shape index: {}]   ;;  %s2988_s5 = inlined_call_operand.hbm [shape: f32[32,32], index: 5, kind: input, shape index: {}]   ;;  %s2989_s6 = inlined_call_operand.vmem [shape: f32[1,32], index: 6, kind: input, shape index: {}]   ;;  %s2990_s7 = inlined_call_operand.hbm [shape: f32[2,8,32], index: 7, kind: output, shape index: {}]  }
   0x1   :  { %2998 = sst [smem:[#allocation19_spill]] %s2989_s6 }
   0x2   :  { %2999 = sst [smem:[#allocation20_spill]] %s2990_s7 }
   0x3   :  { %12 = vsyncpa [#allocation5], 0 }
   0x4   :  { %14 = vsyncpa [#allocation5 + $0x1], 0 }
   0x5   :  { %15 = vsyncpa [#allocation8], 0 }
   0x6   :  { %16 = vsyncpa [#allocation11], 0 }
   0x7   :  { %17 = vsyncpa [#allocation6], 0 }
   0x8   :  { %19 = vsyncpa [#allocation6 + $0x1], 0  ;;  %s2546_s24 = smov 0   ;;  %s2548_s25 = smov 0  }
   0x9   :  { %s2550_s26 = smov 0   ;;  %s2552_s27 = smov 0  }
   0xa   :  { %s2554_s28 = smov 0   ;;  %s2556_s29 = smov 0  }
   0xb LB: > { %3000 = sst [smem:[#allocation17_spill]] %s2465_s24  ;;  %s1991_s30 = sadd.s32 4294967295, %s2485_s29   ;;  %s2485_s29 = sphi %s2556_s29, %s25_s29   ;;  %s2481_s28 = sphi %s2554_s28, %s3025_s28   ;;  %s2477_s27 = sphi %s2552_s27, %s3024_s27   ;;  %s2473_s26 = sphi %s2550_s26, %s3023_s26   ;;  %s2469_s25 = sphi %s2548_s25, %s3022_s25   ;;  %s2465_s24 = sphi %s2546_s24, %s3021_s24  }
   0xc   : > { %s1992_s8 = sadd.s32 4294967294, %s2485_s29   ;;  %p57_p0 = scmp.ne.s32.totalorder %s2469_s25, %s2465_s24 }
   0xd   : > { %p2580_p1 = scmp.eq.s32.totalorder %s1991_s30, 0  ;;  %p2584_p2 = scmp.eq.s32.totalorder %s1991_s30, 1 }
   0xe   : > { %p215_p3 = scmp.eq.s32.totalorder %s1992_s8, 1  ;;  %p1993_p5 = scmp.ge.s32.totalorder %s2485_s29, 1 }
   0xf   : > { %s3001_s9 = scalar_select %p2580_p1, 1, 0 }
  0x10   : > { %s3002_s10 = scalar_select %p2584_p2, 1, 0 }
  0x11   : > { %p2590_p4 = por %p2580_p1, %p57_p0  ;;  %p2595_p6 = por %p215_p3, %p57_p0 }
  0x12   : > { %p222_p7 = scmp.lt.s32.totalorder %s2485_s29, 3  ;;  %s2487_s14 = smov [#allocation7]  }
  0x13   : > { %s3003_s11 = scalar_select %p2590_p4, 1, 0 }
  0x14   : > { %s3004_s12 = scalar_select %p2595_p6, 1, 0 }
  0x15   : > { %p2600_p8 = pnand %p1993_p5, %p222_p7  ;;  %s234_s15 = sshll.u32 %s2487_s14, 4  ;;  %s2604_s15 = int_to_ptr.vmem [resolvable:$true] %s234_s15 }
  0x16   : > { %3005 = sst [smem:[#allocation18_spill]] %s3004_s12  ;;  %s2488_s17 = smov [#allocation9]  }
  0x17   : > { %s3006_s13 = scalar_select %p2600_p8, 1, 0 }
  0x18   : > { %p2174_p9 = pneg %p2600_p8  ;;  %s250_s18 = sshll.u32 %s2488_s17, 4  ;;  %s2615_s18 = int_to_ptr.vmem [resolvable:$true] %s250_s18 }
  0x19   : > { %s2489_s19 = smov [#allocation10]   ;;  %s2281_s23 = scalar_lea.hbm %s2984_s1, 512 }
  0x1a   : > { %p2611_p11 = pnand %p2174_p9, %p2580_p1  ;;  %s2617_s20 = sshll.u32 %s2489_s19, 4  ;;  %s267_s20 = int_to_ptr.vmem [resolvable:$true] %s2617_s20 }
  0x1b   : > { %p2282_p12 = scmp.ne.s32.totalorder %s2984_s1, %s2281_s23  ;;  %p2288_p5 = scmp.lt.u32.totalorder %s2281_s23, %s2984_s1 }
  0x1c   : > { %p2627_p13 = pneg %p2611_p11 }
  0x1e   : > { %p2284_p0 = pnand %p2627_p13, %p2282_p12 }
  0x20   : > { %p2285_p3 = pneg %p2284_p0 }
  0x22   : > { %p2290_p7 = pnand %p2288_p5, %p2285_p3 }
  0x24   : > { %2293 = shalt.err (!%p2290_p7)
}
  0x25   : > { %s2294_s21 = scalar_lea.vmem %s2604_s15, 512  ;;  %p2302_p1 = scmp.lt.s32.totalorder %s2604_s15, %s2604_s15 }
  0x26   : > { %p2295_p9 = scmp.ne.s32.totalorder %s2604_s15, %s2294_s21  ;;  %p2303_p4 = scmp.lt.s32.totalorder %s2294_s21, %s2294_s21 }
  0x28   : > { %p2297_p10 = pnand %p2295_p9, %p2627_p13  ;;  %p2304_p12 = por %p2303_p4, %p2302_p1 }
  0x2a   : > { %p2298_p6 = pneg %p2297_p10 }
  0x2c   : > { %p2305_p0 = pnand %p2304_p12, %p2298_p6 }
  0x2e   : > { %2308 = shalt.err (!%p2305_p0)
}
  0x2f   : > { %s2490_s22 = smov 128   ;;  %s2491_s23 = smov 8  }
  0x30   : > { %2177 = dma.hbm_to_vmem [thread:$0]  (!%p2611_p11), %s2984_s1, 512, %s2604_s15, [#allocation8], %s2490_s22, %s2490_s22, %s2491_s23  }
  0x31   : > { %s2309_s21 = scalar_lea.hbm %s2986_s3, 512 }
  0x32   : > { %p2310_p1 = scmp.ne.s32.totalorder %s2986_s3, %s2309_s21  ;;  %p2316_p10 = scmp.lt.u32.totalorder %s2309_s21, %s2986_s3 }
  0x34   : > { %p2312_p4 = pnand %p2310_p1, %p2627_p13 }
  0x36   : > { %p2313_p6 = pneg %p2312_p4 }
  0x38   : > { %p2318_p3 = pnand %p2316_p10, %p2313_p6 }
  0x3a   : > { %2321 = shalt.err (!%p2318_p3)
}
  0x3b   : > { %s2322_s15 = scalar_lea.vmem %s2615_s18, 512  ;;  %p2330_p12 = scmp.lt.s32.totalorder %s2615_s18, %s2615_s18 }
  0x3c   : > { %p2323_p5 = scmp.ne.s32.totalorder %s2615_s18, %s2322_s15  ;;  %p2331_p0 = scmp.lt.s32.totalorder %s2322_s15, %s2322_s15 }
  0x3e   : > { %p2325_p7 = pnand %p2323_p5, %p2627_p13  ;;  %p2332_p1 = por %p2331_p0, %p2330_p12 }
  0x40   : > { %p2326_p9 = pneg %p2325_p7 }
  0x42   : > { %p2333_p4 = pnand %p2332_p1, %p2326_p9 }
  0x44   : > { %2336 = shalt.err (!%p2333_p4)
}
  0x45   : > { %2180 = dma.hbm_to_vmem [thread:$0]  (!%p2611_p11), %s2986_s3, 512, %s2615_s18, [#allocation8], %s2490_s22, %s2490_s22, %s2491_s23  }
  0x46   : > { %s2337_s30 = scalar_lea.hbm %s2988_s5, 512 }
  0x47   : > { %p2338_p6 = scmp.ne.s32.totalorder %s2988_s5, %s2337_s30  ;;  %p2344_p5 = scmp.lt.u32.totalorder %s2337_s30, %s2988_s5 }
  0x49   : > { %p2340_p10 = pnand %p2338_p6, %p2627_p13 }
  0x4b   : > { %p2341_p3 = pneg %p2340_p10 }
  0x4d   : > { %p2346_p7 = pnand %p2344_p5, %p2341_p3 }
  0x4f   : > { %2349 = shalt.err (!%p2346_p7)
}
  0x50   : > { %s2350_s15 = scalar_lea.vmem %s267_s20, 512  ;;  %p2358_p1 = scmp.lt.s32.totalorder %s267_s20, %s267_s20 }
  0x51   : > { %p2351_p9 = scmp.ne.s32.totalorder %s267_s20, %s2350_s15  ;;  %p2359_p4 = scmp.lt.s32.totalorder %s2350_s15, %s2350_s15 }
  0x53   : > { %p2353_p12 = pnand %p2351_p9, %p2627_p13  ;;  %p2360_p8 = por %p2359_p4, %p2358_p1 }
  0x55   : > { %p2354_p0 = pneg %p2353_p12 }
  0x57   : > { %p2361_p2 = pnand %p2360_p8, %p2354_p0 }
  0x59   : > { %2364 = shalt.err (!%p2361_p2)
}
  0x5a   : > { %2183 = dma.hbm_to_vmem [thread:$0]  (!%p2611_p11), %s2988_s5, 512, %s267_s20, [#allocation11], %s2490_s22, %s2490_s22, %s2491_s23  }
  0x5b   : > { %s44_s14 = sadd.s32 1, %s2473_s26  ;;  %s37_s16 = sadd.s32 1, %s2481_s28 }
  0x5c   : > { %p51_p2 = scmp.ne.s32.totalorder %s2473_s26, %s2469_s25  ;;  %p39_p8 = scmp.ge.s32.totalorder %s37_s16, 2 }
  0x5d   : > { %p52_p13 = scmp.eq.s32.totalorder %s2485_s29, 0  ;;  %p3009_p6 = scmp.ne.s32.totalorder %s3002_s10, 0 }
  0x5e   : > { %p2195_p3 = scmp.lt.s32.totalorder %s2485_s29, 2  ;;  %s3027_s16 = smov (%p39_p8, %s37_s16), 0 }
  0x5f   : > { %p2706_p10 = por %p3009_p6, %p51_p2  ;;  %p53_p5 = por %p52_p13, %p51_p2 }
  0x60   : > { %s283_s24 = sand.u32 1, %s2473_s26   ;;  %s41_s12 = ssub.s32 %s2481_s28, %s3027_s16 }
  0x61   : > { %p42_p7 = scmp.eq.s32.totalorder %s41_s12, 0  ;;  %s1998_s20 = sshll.u32 %s283_s24, 3 }
  0x62   : > { %s1999_s22 = sshll.u32 %s2481_s28, 7  ;;  %s287_s17 = scalar_lea.vmem [#allocation4], %s1998_s20 }
  0x63   : > { %s2718_s23 = scalar_select %p42_p7, %s2473_s26, %s44_s14  }
  0x64   : > { %s2723_s10 = scalar_lea.hbm %s2983_s0, %s1999_s22  ;;  %s294_s19 = sshll.u32 %s287_s17, 4  ;;  %s2725_s19 = int_to_ptr.vmem [resolvable:$true] %s294_s19 }
  0x65   : > { %p2729_p11 = pnand %p2195_p3, %p53_p5  ;;  %s284_s15 = scalar_lea.sflag [#allocation5], %s283_s24 }
  0x66   : > { %s2365_s18 = scalar_lea.hbm %s2723_s10, 128  ;;  %s2370_s12 = scalar_lea.hbm %s2983_s0, 256 }
  0x67   : > { %p2366_p9 = scmp.ne.s32.totalorder %s2723_s10, %s2365_s18  ;;  %p2367_p12 = pneg %p2729_p11 }
  0x68   : > { %p2371_p4 = scmp.lt.u32.totalorder %s2723_s10, %s2983_s0  ;;  %p2372_p2 = scmp.lt.u32.totalorder %s2370_s12, %s2365_s18 }
  0x69   : > { %p2368_p0 = pnand %p2367_p12, %p2366_p9  ;;  %p2374_p13 = scmp.lt.u32.totalorder %s2365_s18, %s2723_s10 }
  0x6a   : > { %p2373_p8 = por %p2372_p2, %p2371_p4 }
  0x6b   : > { %p2369_p1 = pneg %p2368_p0 }
  0x6c   : > { %p2375_p6 = por %p2374_p13, %p2373_p8 }
  0x6e   : > { %p2376_p3 = pnand %p2375_p6, %p2369_p1 }
  0x70   : > { %2379 = shalt.err (!%p2376_p3)
}
  0x71   : > { %s2380_s24 = scalar_lea.vmem %s2725_s19, 128  ;;  %s2492_s30 = smov [#allocation4]  }
  0x72   : > { %p2381_p5 = scmp.ne.s32.totalorder %s2725_s19, %s2380_s24  ;;  %s2385_s8 = sshll.u32 %s2492_s30, 4  ;;  %s2386_s8 = int_to_ptr.vmem [resolvable:$false] %s2385_s8 }
  0x73   : > { %s2387_s17 = scalar_lea.vmem %s2386_s8, 256  ;;  %p2388_p0 = scmp.lt.s32.totalorder %s2725_s19, %s2386_s8 }
  0x74   : > { %p2383_p7 = pnand %p2381_p5, %p2367_p12  ;;  %p2389_p4 = scmp.lt.s32.totalorder %s2387_s17, %s2380_s24 }
  0x76   : > { %p2384_p9 = pneg %p2383_p7  ;;  %p2390_p2 = por %p2389_p4, %p2388_p0 }
  0x78   : > { %p2391_p8 = pnand %p2390_p2, %p2384_p9 }
  0x7a   : > { %2394 = shalt.err (!%p2391_p8)
}
  0x7b   : > { %2187 = dma.hbm_to_vmem [thread:$0]  (!%p2729_p11), %s2723_s10, 128, %s2725_s19, %s284_s15  }
  0x7c   : > { %p3012_p1 = scmp.ne.s32.totalorder %s3006_s13, 0 }
  0x7d   : > { %s2761_s18 = sand.u32 (!%p3012_p1), 1, %s2469_s25   ;;  %p3013_p12 = scmp.ne.s32.totalorder (!%p3012_p1), %s3003_s11, 0 }
  0x7e   : > { %303 = sbr.rel (%p3012_p1) target bundleno = 1470 (0x5be), region = 48  ;;  %s2001_s6 = sshll.u32 (!%p3012_p1), %s2761_s18, 3 }
  0x7f   : > { %s306_s14 = scalar_lea.sflag (!%p3012_p1), [#allocation5], %s2761_s18  ;;  %s2767_s12 = scalar_lea.vmem (!%p3012_p1), [#allocation4], %s2001_s6 }
  0x85   : > { %2448 = dma.done.wait (%p3013_p12), %s306_s14, 128  }
  0x86   : > { %2450 = vsyncadd (%p3013_p12), %s306_s14, 4294967168  ;;  %p3014_p11 = scmp.ne.s32.totalorder %s3001_s9, 0 }
  0x88   : > { %2452 = dma.done.wait (%p3014_p11), [#allocation8], 1024  }
  0x89   : > { %2454 = vsyncadd (%p3014_p11), [#allocation8], 4294966272 }
  0x8a   : > { %2456 = dma.done.wait (%p3014_p11), [#allocation11], 512  }
  0x8b   : > { %2458 = vsyncadd (%p3014_p11), [#allocation11], 4294966784  ;;  %v2493_v0 = vmov 0.0|0.0   ;;  %vm2494_vm0 = vmmov 0   ;;  %v2495_v1 = vmov 0.0   ;;  %v357_v2 = vld [vmem:[#allocation9] sm:$0xff]  ;;  %v457_v25 = vlaneseq }
  0x8c   : > { %2140 = vmatprep.subr.bf16.mxu0 %v2493_v0  ;;  %2146 = vmatprep.subr.bf16.mxu1 %v2493_v0  ;;  %v358_v3 = vld [vmem:[#allocation9 + $0x8] sm:$0xff]  ;;  %v359_v4 = vld [vmem:[#allocation9 + $0x10] sm:$0xff]  ;;  %v360_v6 = vld [vmem:[#allocation9 + $0x18] sm:$0xff]  ;;  %vm368_vm1 = vcmask 261120   ;;  %s2496_s19 = smov 104   ;;  %s2497_s21 = smov 120  }
  0x8d   : > { %2075 = vmatprep.mubr.msk.f32.mxu0 %vm2494_vm0, %v2495_v1  ;;  %2086 = vmatprep.mubr.msk.f32.mxu1 %vm2494_vm0, %v2495_v1  ;;  %v2141_v5 = vpack.c.bf16 %v358_v3, %v357_v2  ;;  %v748_v7 = vld [vmem:[#allocation7] sm:$0xff]  ;;  %v749_v8 = vld [vmem:[#allocation7 + $0x8] sm:$0xff]  ;;  %v750_v10 = vld [vmem:[#allocation7 + $0x10] sm:$0xff]  ;;  %v2144_v12 = vpack.c.bf16 %v360_v6, %v359_v4  ;;  %s2498_s15 = smov 112   ;;  %s2499_s20 = smov 96   ;;  %v458_v29 = vshrl.u32 %v457_v25, 7 }
  0x8e   : > { %v2147_v9 = vpack.c.bf16 %v749_v8, %v748_v7  ;;  %v751_v11 = vld [vmem:[#allocation7 + $0x18] sm:$0xff]  ;;  %v2006_v15 = vld [vmem:[%s2987_s4] ss:$0 sm:$0xff]  ;;  %v2500_v23 = vmov 1983009808   ;;  %vm588_vm2 = vcmask 64512  }
  0x8f   : > { %2142 = vmatpush3.bf16.msra.mxu0 %v2141_v5  ;;  %v2150_v13 = vpack.c.bf16 %v751_v11, %v750_v10  ;;  %v356_v14 = vld [vmem:[%s2767_s12] sm:$0xff]  ;;  %v455_v24 = vunpack.c.l.s4 %v2500_v23  ;;  %v2501_v26 = vmov 1934713408   ;;  %s2502_s22 = smov 16   ;;  %s2503_s24 = smov 8   ;;  %vm1777_vm3 = vcmask 130048  }
  0x90   : > { %2143 = vmatprep.subr.bf16.mxu0 %v2493_v0  ;;  %2148 = vmatpush3.bf16.msra.mxu1 %v2147_v9  ;;  %v2012_v17 = vld [vmem:[%s2985_s2] ss:$0 sm:$0xff]  ;;  %v487_v27 = vunpack.c.l.s4 %v2501_v26  ;;  %s2504_s30 = smov 24   ;;  %vm1779_vm4 = vcmask 195584   ;;  %s3015_s14 = sld [smem:[#allocation19_spill]] }
  0x91   : > { %2149 = vmatprep.subr.bf16.mxu1 %v2493_v0  ;;  %v456_v28 = vunpack.c.0.s8 %v455_v24  ;;  %s2033_s12 = sshll.u32 %s2477_s27, 7  ;;  %s351_s9 = scalar_lea.vmem [#allocation12], %s2001_s6 }
  0x92   : > { %v488_v32 = vunpack.c.0.s8 %v487_v27  ;;  %s1881_s11 = sshll.u32 %s351_s9, 4  ;;  %s2505_s6 = smov [#allocation12]   ;;  %s2935_s11 = int_to_ptr.vmem [resolvable:$true] %s1881_s11 }
  0x93   : > { %2145 = vmatpush3.bf16.msra.mxu0 %v2144_v12  ;;  %v2804_v33 = vsub.s32 %v456_v28, %v458_v29  ;;  %s2395_s27 = scalar_lea.vmem %s2935_s11, 128 }
  0x94   : > { %2151 = vmatpush3.bf16.msra.mxu1 %v2150_v13  ;;  %2099 = vmatprep.subr.mxu0 %v2495_v1  ;;  %v2806_v40 = vsub.s32 %v488_v32, %v458_v29  ;;  %p2396_p13 = scmp.ne.s32.totalorder %s2935_s11, %s2395_s27 }
  0x95   : > { %2089 = vmatprep.subr.mxu1 %v2495_v1 }
  0x96   : > { %2076 = vmatmul.mubr.msk.f32.vlgmr.msra.gmra.mrb[0].mxu0 %vm368_vm1, %v356_v14  ;;  %p2397_p6 = pnand %p2396_p13, %p2706_p10 }
  0x97   : > { %2087 = vmatmul.mubr.msk.f32.vlgmr.msra.gmra.mrb[0].mxu1 %vm368_vm1, %v356_v14  ;;  %2101 = vmatprep.mubr.msk.f32.mxu0 %vm2494_vm0, %v2495_v1 }
  0x98   : > { %2091 = vmatprep.mubr.msk.f32.mxu1 %vm2494_vm0, %v2495_v1  ;;  %p2398_p3 = pneg %p2397_p6 }
 0x169   : > { %v438_v16 = vpop.f32.mrb[0].mxu0 }
 0x16a   : > { %v439_v18 = vadd.f32 %v2006_v15, %v438_v16  ;;  %v2077_v19 = vpop.f32.mrb[1].mxu0  ;;  %v829_v20 = vpop.f32.mrb[0].mxu1 }
 0x16b   : > { %v2088_v21 = vpop.f32.mrb[1].mxu1  ;;  %v830_v22 = vadd.f32 %v2012_v17, %v829_v20 }
 0x16c   : > { %449 = vrot.lane.b32.xlu1 %v439_v18, %s2496_s19  ;;  %443 = vrot.lane.b32.xlu0 %v439_v18, %s2497_s21 }
 0x170   : > { %834 = vrot.lane.b32.xlu1 %v830_v22, %s2497_s21  ;;  %446 = vrot.lane.b32.xlu0 %v439_v18, %s2498_s15 }
 0x174   : > { %840 = vrot.lane.b32.xlu1 %v830_v22, %s2496_s19  ;;  %837 = vrot.lane.b32.xlu0 %v830_v22, %s2498_s15  ;;  %s3016_s19 = sld [smem:[#allocation20_spill]]  ;;  %s1867_s15 = scalar_lea.sflag [#allocation6], %s2761_s18 }
 0x178   : > { %593 = vrot.lane.b32.xlu0 %v439_v18, %s2499_s20 }
 0x17a   : > { %s2933_s21 = scalar_lea.hbm %s3016_s19, %s2033_s12 }
 0x1de   : > { %v450_v30 = vpop.permute.xlu1 %449  ;;  %v444_v31 = vpop.permute.xlu0 %443 }
 0x1df   : > { %595 = vrot.lane.b32.xlu1 %v444_v31, %s2499_s20  ;;  %v468_v34 = vcombine.low %v444_v31, %v450_v30  ;;  %v469_v35 = vcombine.high %v444_v31, %v450_v30 }
 0x1e1   : > { %v476_v41 = vrot.slane %v468_v34, %v2804_v33  ;;  %v483_v42 = vrot.slane %v469_v35, %v2804_v33 }
 0x1e2   : > { %v835_v36 = vpop.permute.xlu1 %834  ;;  %v447_v37 = vpop.permute.xlu0 %446 }
 0x1e3   : > { %v452_v38 = vcombine.low %v439_v18, %v447_v37  ;;  %v453_v39 = vcombine.high %v439_v18, %v447_v37  ;;  %599 = vrot.lane.b32.xlu1 %v450_v30, %s2499_s20  ;;  %597 = vrot.lane.b32.xlu0 %v447_v37, %s2499_s20  ;;  %s2399_s20 = sshll.u32 %s2505_s6, 4  ;;  %s2400_s20 = int_to_ptr.vmem [resolvable:$false] %s2399_s20 }
 0x1e4   : > { %p2402_p5 = scmp.lt.s32.totalorder %s2935_s11, %s2400_s20 }
 0x1e5   : > { %v460_v43 = vrot.slane %v452_v38, %v2804_v33  ;;  %v467_v44 = vrot.slane %v453_v39, %v2804_v33 }
 0x1e6   : > { %v841_v45 = vpop.permute.xlu1 %840  ;;  %v838_v46 = vpop.permute.xlu0 %837 }
 0x1e7   : > { %v484_v47 = vcombine.low %v460_v43, %v476_v41  ;;  %v485_v48 = vcombine.high %v460_v43, %v476_v41  ;;  %v500_v49 = vcombine.low %v467_v44, %v483_v42  ;;  %v501_v50 = vcombine.high %v467_v44, %v483_v42 }
 0x1e8   : > { %v859_v51 = vcombine.low %v835_v36, %v841_v45  ;;  %v860_v52 = vcombine.high %v835_v36, %v841_v45  ;;  %v843_v53 = vcombine.low %v830_v22, %v838_v46  ;;  %v844_v54 = vcombine.high %v830_v22, %v838_v46 }
 0x1e9   : > { %v492_v55 = vrot.slane %v484_v47, %v2806_v40  ;;  %v499_v56 = vrot.slane %v485_v48, %v2806_v40  ;;  %v508_v57 = vrot.slane %v500_v49, %v2806_v40  ;;  %v515_v58 = vrot.slane %v501_v50, %v2806_v40 }
 0x1ea   : > { %v867_v59 = vrot.slane %v859_v51, %v2804_v33  ;;  %v874_v60 = vrot.slane %v860_v52, %v2804_v33  ;;  %v851_v61 = vrot.slane %v843_v53, %v2804_v33  ;;  %v858_v62 = vrot.slane %v844_v54, %v2804_v33 }
 0x1eb   : > { %v520_v63 = vcombine.low %v492_v55, %v499_v56  ;;  %v2008_v2 = vcombine.high %v492_v55, %v499_v56  ;;  %v536_v3 = vcombine.low %v508_v57, %v515_v58  ;;  %v2009_v4 = vcombine.high %v508_v57, %v515_v58  ;;  %v594_v55 = vpop.permute.xlu0 %593 }
 0x1ec   : > { %v875_v5 = vcombine.low %v851_v61, %v867_v59  ;;  %v876_v6 = vcombine.high %v851_v61, %v867_v59  ;;  %v891_v7 = vcombine.low %v858_v62, %v874_v60  ;;  %v892_v8 = vcombine.high %v858_v62, %v874_v60 }
 0x1ed   : > { %v527_v9 = vrot.slane %v520_v63, %v2804_v33  ;;  %v535_v10 = vrot.slane %v2008_v2, %v2804_v33  ;;  %v543_v11 = vrot.slane %v536_v3, %v2804_v33  ;;  %v551_v12 = vrot.slane %v2009_v4, %v2804_v33 }
 0x1ee   : > { %v883_v13 = vrot.slane %v875_v5, %v2806_v40  ;;  %v890_v14 = vrot.slane %v876_v6, %v2806_v40  ;;  %v899_v15 = vrot.slane %v891_v7, %v2806_v40  ;;  %v906_v16 = vrot.slane %v892_v8, %v2806_v40 }
 0x1ef   : > { %v552_v17 = vcombine.low %v527_v9, %v535_v10  ;;  %v553_v18 = vcombine.high %v527_v9, %v535_v10  ;;  %v568_v19 = vcombine.low %v543_v11, %v551_v12  ;;  %v569_v20 = vcombine.high %v543_v11, %v551_v12 }
 0x1f0   : > { %v911_v21 = vcombine.low %v883_v13, %v890_v14  ;;  %v2014_v22 = vcombine.high %v883_v13, %v890_v14  ;;  %v927_v23 = vcombine.low %v899_v15, %v906_v16  ;;  %v2015_v24 = vcombine.high %v899_v15, %v906_v16 }
 0x1f1   : > { %v560_v25 = vrot.slane %v552_v17, %v2806_v40  ;;  %v567_v26 = vrot.slane %v553_v18, %v2806_v40  ;;  %v576_v27 = vrot.slane %v568_v19, %v2806_v40  ;;  %v583_v28 = vrot.slane %v569_v20, %v2806_v40 }
 0x1f2   : > { %v918_v29 = vrot.slane %v911_v21, %v2804_v33  ;;  %v926_v30 = vrot.slane %v2014_v22, %v2804_v33  ;;  %v934_v31 = vrot.slane %v927_v23, %v2804_v33  ;;  %v942_v32 = vrot.slane %v2015_v24, %v2804_v33 }
 0x1f3   : > { %v584_v34 = vcombine.low %v560_v25, %v576_v27  ;;  %v585_v35 = vcombine.high %v560_v25, %v576_v27  ;;  %v586_v36 = vcombine.low %v567_v26, %v583_v28  ;;  %v587_v37 = vcombine.high %v567_v26, %v583_v28 }
 0x1f4   : > { %v943_v38 = vcombine.low %v918_v29, %v926_v30  ;;  %v944_v39 = vcombine.high %v918_v29, %v926_v30  ;;  %v959_v41 = vcombine.low %v934_v31, %v942_v32  ;;  %v960_v42 = vcombine.high %v934_v31, %v942_v32 }
 0x1f5   : > { %589 = vst.msk [vmem:[#allocation2] sm:$0xff] %vm588_vm2, %v584_v34  ;;  %590 = vst.msk [vmem:[#allocation2 + $0x8] sm:$0xff] %vm588_vm2, %v585_v35 }
 0x1f6   : > { %591 = vst.msk [vmem:[#allocation2 + $0x10] sm:$0xff] %vm588_vm2, %v586_v36  ;;  %592 = vst.msk [vmem:[#allocation2 + $0x18] sm:$0xff] %vm588_vm2, %v587_v37  ;;  %v951_v43 = vrot.slane %v943_v38, %v2806_v40  ;;  %v967_v44 = vrot.slane %v959_v41, %v2806_v40  ;;  %v958_v45 = vrot.slane %v944_v39, %v2806_v40 }
 0x1f7   : > { %v974_v46 = vrot.slane %v960_v42, %v2806_v40 }
 0x1f8   : > { %v975_v49 = vcombine.low %v951_v43, %v967_v44  ;;  %v976_v52 = vcombine.high %v951_v43, %v967_v44 }
 0x1f9   : > { %v977_v50 = vcombine.low %v958_v45, %v974_v46  ;;  %v978_v54 = vcombine.high %v958_v45, %v974_v46 }
 0x1fc   : > { %v979_v47 = vld [vmem:[#allocation2] sm:$0xff]  ;;  %v980_v51 = vld [vmem:[#allocation2 + $0x8] sm:$0xff] }
 0x1fd   : > { %v981_v48 = vld [vmem:[#allocation2 + $0x10] sm:$0xff]  ;;  %2090 = vmatpush3.xpose.msk.msra.mxu1 %vm588_vm2, %v979_v47  ;;  %v982_v53 = vld [vmem:[#allocation2 + $0x18] sm:$0xff] }
 0x1fe   : > { %2100 = vmatpush3.xpose.msk.msra.mxu0 %vm588_vm2, %v981_v48  ;;  %2094 = vmatprep.subr.mxu1 %v2495_v1 }
 0x1ff   : > { %2109 = vmatprep.subr.mxu0 %v2495_v1 }
 0x200   : > { %2092 = vmatmul.mubr.msk.f32.vlgmr.msra.gmra.mrb[2].mxu1 %vm588_vm2, %v975_v49 }
 0x201   : > { %2102 = vmatmul.mubr.msk.f32.vlgmr.msra.gmra.mrb[2].mxu0 %vm588_vm2, %v977_v50  ;;  %2095 = vmatpush3.xpose.msk.msra.mxu1 %vm588_vm2, %v980_v51 }
 0x202   : > { %2096 = vmatprep.mubr.msk.f32.mxu1 %vm2494_vm0, %v2495_v1  ;;  %2104 = vmatprep.subr.mxu1 %v2495_v1 }
 0x203   : > { %2111 = vmatprep.mubr.msk.f32.mxu0 %vm2494_vm0, %v2495_v1 }
 0x204   : > { %2097 = vmatmul.mubr.msk.f32.vlgmr.msra.gmra.mrb[4].mxu1 %vm588_vm2, %v976_v52 }
 0x205   : > { %2105 = vmatpush3.xpose.msk.msra.mxu1 %vm588_vm2, %v982_v53  ;;  %2106 = vmatprep.mubr.msk.f32.mxu1 %vm2494_vm0, %v2495_v1 }
 0x206   : > { %2114 = vmatprep.subr.mxu1 %v2495_v1 }
 0x208   : > { %2107 = vmatmul.mubr.msk.f32.vlgmr.msra.gmra.mrb[6].mxu1 %vm588_vm2, %v978_v54 }
 0x209   : > { %2116 = vmatprep.mubr.msk.f32.mxu1 %vm2494_vm0, %v2495_v1 }
 0x251   : > { %v596_v56 = vpop.permute.xlu1 %595 }
 0x255   : > { %v600_v57 = vpop.permute.xlu1 %599  ;;  %v598_v58 = vpop.permute.xlu0 %597 }
 0x256   : > { %v621_v59 = vcombine.low %v596_v56, %v600_v57  ;;  %v622_v60 = vcombine.high %v596_v56, %v600_v57  ;;  %v605_v61 = vcombine.low %v594_v55, %v598_v58  ;;  %v606_v62 = vcombine.high %v594_v55, %v598_v58 }
 0x258   : > { %v629_v63 = vrot.slane %v621_v59, %v2804_v33  ;;  %v636_v2 = vrot.slane %v622_v60, %v2804_v33  ;;  %v613_v3 = vrot.slane %v605_v61, %v2804_v33  ;;  %v620_v4 = vrot.slane %v606_v62, %v2804_v33 }
 0x25a   : > { %v637_v5 = vcombine.low %v613_v3, %v629_v63  ;;  %v638_v6 = vcombine.high %v613_v3, %v629_v63  ;;  %v653_v7 = vcombine.low %v620_v4, %v636_v2  ;;  %v654_v8 = vcombine.high %v620_v4, %v636_v2 }
 0x25c   : > { %v645_v9 = vrot.slane %v637_v5, %v2806_v40  ;;  %v652_v10 = vrot.slane %v638_v6, %v2806_v40  ;;  %v661_v11 = vrot.slane %v653_v7, %v2806_v40  ;;  %v668_v12 = vrot.slane %v654_v8, %v2806_v40 }
 0x25e   : > { %v673_v13 = vcombine.low %v645_v9, %v652_v10  ;;  %v2010_v14 = vcombine.high %v645_v9, %v652_v10  ;;  %v689_v15 = vcombine.low %v661_v11, %v668_v12  ;;  %v2011_v16 = vcombine.high %v661_v11, %v668_v12  ;;  %v1781_v9 = vld [vmem:[#allocation10] sm:$0xff]  ;;  %v1782_v10 = vld [vmem:[#allocation10 + $0x8] sm:$0xff] }
 0x25f   : > { %v2153_v11 = vpack.c.bf16 %v1782_v10, %v1781_v9 }
 0x260   : > { %v680_v17 = vrot.slane %v673_v13, %v2804_v33  ;;  %v688_v18 = vrot.slane %v2010_v14, %v2804_v33  ;;  %v696_v19 = vrot.slane %v689_v15, %v2804_v33  ;;  %v704_v20 = vrot.slane %v2011_v16, %v2804_v33 }
 0x262   : > { %v705_v21 = vcombine.low %v680_v17, %v688_v18  ;;  %v706_v22 = vcombine.high %v680_v17, %v688_v18  ;;  %v721_v23 = vcombine.low %v696_v19, %v704_v20  ;;  %v722_v24 = vcombine.high %v696_v19, %v704_v20 }
 0x264   : > { %v713_v25 = vrot.slane %v705_v21, %v2806_v40  ;;  %v720_v26 = vrot.slane %v706_v22, %v2806_v40  ;;  %v729_v27 = vrot.slane %v721_v23, %v2806_v40  ;;  %v736_v28 = vrot.slane %v722_v24, %v2806_v40 }
 0x266   : > { %v737_v29 = vcombine.low %v713_v25, %v729_v27  ;;  %v738_v30 = vcombine.high %v713_v25, %v729_v27  ;;  %v739_v31 = vcombine.low %v720_v26, %v736_v28  ;;  %v740_v32 = vcombine.high %v720_v26, %v736_v28 }
 0x268   : > { %741 = vst.msk [vmem:[#allocation3] sm:$0xff] %vm588_vm2, %v737_v29  ;;  %742 = vst.msk [vmem:[#allocation3 + $0x8] sm:$0xff] %vm588_vm2, %v738_v30 }
 0x269   : > { %743 = vst.msk [vmem:[#allocation3 + $0x10] sm:$0xff] %vm588_vm2, %v739_v31  ;;  %744 = vst.msk [vmem:[#allocation3 + $0x18] sm:$0xff] %vm588_vm2, %v740_v32 }
 0x26f   : > { %v1324_v34 = vld [vmem:[#allocation3] sm:$0xff]  ;;  %v1325_v35 = vld [vmem:[#allocation3 + $0x8] sm:$0xff] }
 0x270   : > { %2110 = vmatpush3.msra.mxu0 %v1324_v34  ;;  %2115 = vmatpush3.msra.mxu1 %v1325_v35  ;;  %v1326_v62 = vld [vmem:[#allocation3 + $0x10] sm:$0xff]  ;;  %v1327_v4 = vld [vmem:[#allocation3 + $0x18] sm:$0xff] }
 0x271   : > { %2119 = vmatprep.subr.mxu0 %v2495_v1  ;;  %2124 = vmatprep.subr.mxu1 %v2495_v1 }
 0x2d3   : > { %v1056_v36 = vpop.f32.mrb[2].mxu1 }
 0x2d4   : > { %v1208_v37 = vpop.f32.mrb[2].mxu0  ;;  %v2093_v38 = vpop.f32.mrb[3].mxu1  ;;  %v1288_v41 = vsel %vm588_vm2, %v1056_v36, -inf }
 0x2d5   : > { %v2103_v39 = vpop.f32.mrb[3].mxu0  ;;  %1289 = vmax.xlane.f32.xlu0 %v1288_v41  ;;  %v1294_v45 = vsel %vm588_vm2, %v1208_v37, -inf }
 0x2d7   : > { %v1132_v42 = vpop.f32.mrb[4].mxu1 }
 0x2d8   : > { %v2098_v43 = vpop.f32.mrb[5].mxu1  ;;  %v1291_v44 = vsel %vm588_vm2, %v1132_v42, -inf }
 0x2d9   : > { %1292 = vmax.xlane.f32.xlu1 %v1291_v44  ;;  %1295 = vmax.xlane.f32.xlu0 %v1294_v45  ;;  %v1783_v44 = vld [vmem:[#allocation10 + $0x10] sm:$0xff]  ;;  %v1784_v45 = vld [vmem:[#allocation10 + $0x18] sm:$0xff] }
 0x2db   : > { %v1284_v46 = vpop.f32.mrb[6].mxu1 }
 0x2dc   : > { %v2108_v47 = vpop.f32.mrb[7].mxu1  ;;  %v1297_v48 = vsel %vm588_vm2, %v1284_v46, -inf }
 0x2dd   : > { %1298 = vmax.xlane.f32.xlu1 %v1297_v48 }
 0x362   : > { %v1290_v49 = vpop.xlane.xlu0 %1289 }
 0x363   : > { %v1300_v50 = vsub.f32 %v1056_v36, %v1290_v49 }
 0x365   : > { %v1304_v51 = vmul.f32 1.442695, %v1300_v50  ;;  %v2156_v50 = vpack.c.bf16 %v1784_v45, %v1783_v44 }
 0x366   : > { %v1293_v52 = vpop.xlane.xlu1 %1292  ;;  %v1296_v53 = vpop.xlane.xlu0 %1295 }
 0x367   : > { %2265 = vpow2.f32 %v1304_v51  ;;  %v1301_v54 = vsub.f32 %v1132_v42, %v1293_v52  ;;  %v1302_v55 = vsub.f32 %v1208_v37, %v1296_v53 }
 0x369   : > { %v1306_v56 = vmul.f32 1.442695, %v1301_v54  ;;  %v1308_v57 = vmul.f32 1.442695, %v1302_v55 }
 0x36a   : > { %v1299_v58 = vpop.xlane.xlu1 %1298 }
 0x36b   : > { %2267 = vpow2.f32 %v1306_v56  ;;  %v1303_v59 = vsub.f32 %v1284_v46, %v1299_v58 }
 0x36c   : > { %2269 = vpow2.f32 %v1308_v57 }
 0x36d   : > { %v1310_v60 = vmul.f32 1.442695, %v1303_v59 }
 0x36f   : > { %2271 = vpow2.f32 %v1310_v60 }
 0x371   : > { %v2266_v61 = vpop.eup %2265 }
 0x372   : > { %2112 = vmatmul.mubr.msk.f32.vlgmr.msra.gmra.mrb[4].mxu0 %vm588_vm2, %v2266_v61  ;;  %v1312_v63 = vsel %vm588_vm2, %v2266_v61, 0.0 }
 0x373   : > { %2120 = vmatpush3.msra.mxu0 %v1326_v62  ;;  %1313 = vadd.xlane.f32.xlu0 %v1312_v63 }
 0x374   : > { %2121 = vmatprep.mubr.msk.f32.mxu0 %vm2494_vm0, %v2495_v1  ;;  %2152 = vmatprep.subr.bf16.mxu0 %v2493_v0 }
 0x375   : > { %v2268_v2 = vpop.eup %2267 }
 0x376   : > { %v2270_v3 = vpop.eup %2269  ;;  %2117 = vmatmul.mubr.msk.f32.vlgmr.msra.gmra.mrb[8].mxu1 %vm588_vm2, %v2268_v2  ;;  %v1315_v5 = vsel %vm588_vm2, %v2268_v2, 0.0 }
 0x377   : > { %2122 = vmatmul.mubr.msk.f32.vlgmr.msra.gmra.mrb[6].mxu0 %vm588_vm2, %v2270_v3  ;;  %2125 = vmatpush3.msra.mxu1 %v1327_v4  ;;  %v1318_v6 = vsel %vm588_vm2, %v2270_v3, 0.0 }
 0x378   : > { %1316 = vadd.xlane.f32.xlu0 %v1315_v5  ;;  %1319 = vadd.xlane.f32.xlu1 %v1318_v6 }
 0x379   : > { %v2272_v7 = vpop.eup %2271  ;;  %2126 = vmatprep.mubr.msk.f32.mxu1 %vm2494_vm0, %v2495_v1  ;;  %2137 = vmatprep.mubr.msk.f32.mxu0 %vm2494_vm0, %v2495_v1 }
 0x37a   : > { %2127 = vmatmul.mubr.msk.f32.vlgmr.msra.gmra.mrb[10].mxu1 %vm588_vm2, %v2272_v7  ;;  %v1321_v8 = vsel %vm588_vm2, %v2272_v7, 0.0  ;;  %2154 = vmatpush3.bf16.msra.mxu0 %v2153_v11 }
 0x37b   : > { %2155 = vmatprep.subr.bf16.mxu0 %v2493_v0 }
 0x37c   : > { %1322 = vadd.xlane.f32.xlu0 %v1321_v8 }
 0x37e   : > { %2157 = vmatpush3.bf16.msra.mxu0 %v2156_v50 }
 0x400   : > { %v1314_v12 = vpop.xlane.xlu0 %1313 }
 0x401   : > { %2273 = vrcp.f32 %v1314_v12 }
 0x405   : > { %v1317_v13 = vpop.xlane.xlu0 %1316  ;;  %v1320_v14 = vpop.xlane.xlu1 %1319 }
 0x406   : > { %2275 = vrcp.f32 %v1320_v14 }
 0x407   : > { %2277 = vrcp.f32 %v1317_v13  ;;  %v2030_v13 = vld [vmem:[%s3015_s14] ss:$0 sm:$0xff] }
 0x409   : > { %v1323_v15 = vpop.xlane.xlu0 %1322 }
 0x40a   : > { %2279 = vrcp.f32 %v1323_v15 }
 0x40b   : > { %v2274_v17 = vpop.eup %2273 }
 0x410   : > { %v2276_v19 = vpop.eup %2275 }
 0x411   : > { %v2278_v25 = vpop.eup %2277 }
 0x414   : > { %v2280_v0 = vpop.eup %2279 }
 0x445   : > { %v1397_v1 = vpop.f32.mrb[4].mxu0 }
 0x446   : > { %v2113_v16 = vpop.f32.mrb[5].mxu0  ;;  %v1624_v22 = vmul.f32 %v2274_v17, %v1397_v1 }
 0x449   : > { %v1470_v18 = vpop.f32.mrb[8].mxu1 }
 0x44a   : > { %v1543_v20 = vpop.f32.mrb[6].mxu0  ;;  %v2118_v21 = vpop.f32.mrb[9].mxu1  ;;  %v1625_v29 = vmul.f32 %v2278_v25, %v1470_v18 }
 0x44b   : > { %v1626_v23 = vmul.f32 %v2276_v19, %v1543_v20  ;;  %v2123_v24 = vpop.f32.mrb[7].mxu0 }
 0x44d   : > { %v1628_v26 = vcombine.low %v1624_v22, %v1626_v23  ;;  %v1629_v27 = vcombine.high %v1624_v22, %v1626_v23  ;;  %v1616_v28 = vpop.f32.mrb[10].mxu1 }
 0x44e   : > { %v1627_v30 = vmul.f32 %v2280_v0, %v1616_v28  ;;  %v2128_v31 = vpop.f32.mrb[11].mxu1 }
 0x44f   : > { %v1636_v35 = vrot.slane %v1628_v26, %v2804_v33  ;;  %v1643_v36 = vrot.slane %v1629_v27, %v2804_v33 }
 0x450   : > { %v1644_v32 = vcombine.low %v1625_v29, %v1627_v30  ;;  %v1645_v34 = vcombine.high %v1625_v29, %v1627_v30 }
 0x452   : > { %v1652_v37 = vrot.slane %v1644_v32, %v2804_v33  ;;  %v1659_v38 = vrot.slane %v1645_v34, %v2804_v33 }
 0x454   : > { %v1660_v39 = vcombine.low %v1636_v35, %v1652_v37  ;;  %v1661_v41 = vcombine.high %v1636_v35, %v1652_v37  ;;  %v1676_v42 = vcombine.low %v1643_v36, %v1659_v38  ;;  %v1677_v43 = vcombine.high %v1643_v36, %v1659_v38 }
 0x456   : > { %v1668_v46 = vrot.slane %v1660_v39, %v2806_v40  ;;  %v1675_v47 = vrot.slane %v1661_v41, %v2806_v40  ;;  %v1684_v48 = vrot.slane %v1676_v42, %v2806_v40  ;;  %v1691_v49 = vrot.slane %v1677_v43, %v2806_v40 }
 0x458   : > { %v1696_v51 = vcombine.low %v1668_v46, %v1675_v47  ;;  %v2028_v52 = vcombine.high %v1668_v46, %v1675_v47  ;;  %v1712_v53 = vcombine.low %v1684_v48, %v1691_v49  ;;  %v2029_v54 = vcombine.high %v1684_v48, %v1691_v49 }
 0x45a   : > { %v1703_v55 = vrot.slane %v1696_v51, %v2804_v33  ;;  %v1711_v56 = vrot.slane %v2028_v52, %v2804_v33  ;;  %v1719_v57 = vrot.slane %v1712_v53, %v2804_v33  ;;  %v1727_v58 = vrot.slane %v2029_v54, %v2804_v33 }
 0x45c   : > { %v1729_v59 = vcombine.high %v1703_v55, %v1711_v56  ;;  %v1745_v60 = vcombine.high %v1719_v57, %v1727_v58  ;;  %v1728_v61 = vcombine.low %v1703_v55, %v1711_v56  ;;  %v1744_v62 = vcombine.low %v1719_v57, %v1727_v58 }
 0x45e   : > { %v1743_v63 = vrot.slane %v1729_v59, %v2806_v40  ;;  %v1759_v2 = vrot.slane %v1745_v60, %v2806_v40  ;;  %v1736_v3 = vrot.slane %v1728_v61, %v2806_v40  ;;  %v1752_v4 = vrot.slane %v1744_v62, %v2806_v40 }
 0x460   : > { %v1762_v5 = vcombine.low %v1743_v63, %v1759_v2  ;;  %v1761_v6 = vcombine.high %v1736_v3, %v1752_v4  ;;  %v1763_v7 = vcombine.high %v1743_v63, %v1759_v2  ;;  %v1760_v8 = vcombine.low %v1736_v3, %v1752_v4 }
 0x462   : > { %1769 = vrot.lane.b32.xlu0 %v1762_v5, %s2502_s22  ;;  %1765 = vrot.lane.b32.xlu1 %v1761_v6, %s2503_s24  ;;  %s2401_s22 = scalar_lea.vmem %s2400_s20, 256 }
 0x463   : > { %p2403_p7 = scmp.lt.s32.totalorder %s2401_s22, %s2395_s27 }
 0x465   : > { %p2404_p9 = por %p2403_p7, %p2402_p5 }
 0x466   : > { %1773 = vrot.lane.b32.xlu1 %v1763_v7, %s2504_s30 }
 0x467   : > { %p2405_p0 = pnand %p2404_p9, %p2398_p3 }
 0x4d4   : > { %v1766_v33 = vpop.permute.xlu1 %1765  ;;  %v1770_v9 = vpop.permute.xlu0 %1769 }
 0x4d5   : > { %v1776_v10 = vsel %vm588_vm2, %v1760_v8, %v1766_v33 }
 0x4d6   : > { %v1778_v11 = vsel %vm1777_vm3, %v1776_v10, %v1770_v9 }
 0x4d8   : > { %v1774_v40 = vpop.permute.xlu1 %1773 }
 0x4d9   : > { %v1780_v12 = vsel %vm1779_vm4, %v1778_v11, %v1774_v40 }
 0x4da   : > { %2138 = vmatmul.mubr.msk.f32.vlgmr.msra.gmra.mrb[8].mxu0 %vm368_vm1, %v1780_v12 }
 0x5ad   : > { %v1861_v14 = vpop.f32.mrb[8].mxu0 }
 0x5ae   : > { %v1862_v15 = vadd.f32 %v2030_v13, %v1861_v14  ;;  %v2139_v1 = vpop.f32.mrb[9].mxu0 }
 0x5b0   : > { %1865 = vst.msk [vmem:[%s351_s9] sm:$0xff] %vm368_vm1, %v1862_v15 }
 0x5b1   : > { %2408 = shalt.err (!%p2405_p0)
}
 0x5b2   : > { %s2409_s18 = scalar_lea.hbm %s2933_s21, 128  ;;  %s2413_s8 = scalar_lea.hbm %s3016_s19, 256 }
 0x5b3   : > { %p2410_p4 = scmp.ne.s32.totalorder %s2933_s21, %s2409_s18  ;;  %p2414_p1 = scmp.lt.u32.totalorder %s2933_s21, %s3016_s19 }
 0x5b4   : > { %p2415_p12 = scmp.lt.u32.totalorder %s2413_s8, %s2409_s18  ;;  %p2417_p13 = scmp.lt.u32.totalorder %s2409_s18, %s2933_s21 }
 0x5b5   : > { %p2411_p2 = pnand %p2410_p4, %p2706_p10 }
 0x5b6   : > { %p2416_p11 = por %p2415_p12, %p2414_p1 }
 0x5b7   : > { %p2412_p8 = pneg %p2411_p2 }
 0x5b8   : > { %p2418_p6 = por %p2417_p13, %p2416_p11 }
 0x5ba   : > { %p2419_p3 = pnand %p2418_p6, %p2412_p8 }
 0x5bc   : > { %2422 = shalt.err (!%p2419_p3)
}
 0x5bd   : > { %2172 = dma.vmem_to_hbm [thread:$0]  (%p2706_p10), %s2935_s11, 128, %s2933_s21, %s1867_s15  }
 0x5be PF: > { %s3017_s12 = sld [smem:[#allocation17_spill]]  ;;  %s3018_s9 = sld [smem:[#allocation18_spill]] }
 0x5bf   : > { %p3020_p7 = scmp.ge.s32.totalorder %s2485_s29, 2 }
 0x5c4   : > { %s1893_s13 = sand.u32 1, %s3017_s12   ;;  %p3019_p5 = scmp.ne.s32.totalorder %s3018_s9, 0 }
 0x5c5   : > { %s1894_s10 = scalar_lea.sflag [#allocation6], %s1893_s13 }
 0x5c6   : > { %p2189_p9 = pnand %p3020_p7, %p3019_p5 }
 0x5c8   : > { %2460 = dma.done.wait (!%p2189_p9), %s1894_s10, 128  }
 0x5c9   : > { %2462 = vsyncadd (!%p2189_p9), %s1894_s10, 4294967168  ;;  %s25_s29 = sadd.s32 1, %s2485_s29   ;;  %s3021_s24 = smov %s2469_s25 }
 0x5ca   : > { %p22_p0 = scmp.ge.s32.totalorder %s25_s29, 4   ;;  %s3022_s25 = smov %s2473_s26 }
 0x5cb   : > { %s3023_s26 = smov %s2718_s23  ;;  %s3024_s27 = smov %s2481_s28 }
 0x5cc   : > { %s3025_s28 = smov %s3027_s16  ;;  %24 = sbr.rel (!%p22_p0) target bundleno = 11 (0xb), region = 110 }
 0x5d3   :  { %1899 = vsyncpa [#allocation5], 1 }
 0x5d4   :  { %1901 = vsyncpa [#allocation5 + $0x1], 1 }
 0x5d5   :  { %1902 = vsyncpa [#allocation8], 1 }
 0x5d6   :  { %1903 = vsyncpa [#allocation11], 1 }
 0x5d7   :  { %1904 = vsyncpa [#allocation6], 1 }
 0x5d8   :  { %1906 = vsyncpa [#allocation6 + $0x1], 1 }

</bundles_post_ra>
